<compile_context>
chip_gen: v6e
topology: v6e:2x2x1
jax: 0.10.0
libtpu: 0.0.40
codegen_flags: <defaults>
</compile_context>

<pallas_src>
import functools
import math

import jax
import jax.numpy as jnp
from jax import lax
from jax.experimental import pallas as pl
from jax.experimental.pallas import tpu as pltpu


def _layernorm(x, gamma, beta, eps=1e-5):
    mu = jnp.mean(x, axis=-1, keepdims=True)
    xc = x - mu
    var = jnp.mean(xc * xc, axis=-1, keepdims=True)
    return xc * lax.rsqrt(var + eps) * gamma + beta


def _gelu_tanh(x):
    # TODO(synk): PyTorch nn.GELU() default is the exact erf form; the tanh
    # approximation (max abs dev ~3e-3) is used since erf has no guaranteed Mosaic
    # lowering.  The in-script reference uses the same approximation.
    c = math.sqrt(2.0 / math.pi)
    return 0.5 * x * (1.0 + jnp.tanh(c * (x + 0.044715 * x * x * x)))


def _vit_stack_kernel(patches_ref, wp_ref, bp_ref, bias_ref,
                      ln1g_ref, ln1b_ref, wqkv_ref, wo_ref, bo_ref,
                      ln2g_ref, ln2b_ref, w1_ref, b1_ref, w2_ref, b2_ref,
                      o_ref, x_sc, *, heads, dim_head):
    l = pl.program_id(0)
    BT, dim = x_sc.shape
    inner = heads * dim_head
    scale = 1.0 / math.sqrt(dim_head)

    # Grid step 0: patch embedding seeds the residual stream held in VMEM scratch.
    @pl.when(l == 0)
    def _():
        x_sc[...] = jnp.dot(patches_ref[...], wp_ref[...],
                            preferred_element_type=jnp.float32) + bp_ref[...]

    x = x_sc[...]                                          # (BT, dim) f32 residual stream

    # ---------------- PreNorm multi-head self-attention + residual ----------------
    xn = _layernorm(x, ln1g_ref[...], ln1b_ref[...])
    qkv = jnp.dot(xn, wqkv_ref[...],
                  preferred_element_type=jnp.float32)      # (BT, 3*inner), fused QKV

    wo = wo_ref[...]                                       # (inner, dim)
    attn_bias = bias_ref[...]                              # (BT, BT): 0 same image, -1e30 across
    contract_last = (((1,), (1,)), ((), ()))               # q @ k^T without an XLU transpose

    attn_out = jnp.zeros((BT, dim), jnp.float32)
    for h in range(heads):                                 # tiny static loop (heads=4)
        q_h = qkv[:, h * dim_head:(h + 1) * dim_head]
        k_h = qkv[:, inner + h * dim_head:inner + (h + 1) * dim_head]
        v_h = qkv[:, 2 * inner + h * dim_head:2 * inner + (h + 1) * dim_head]

        s = lax.dot_general(q_h, k_h, contract_last,
                            preferred_element_type=jnp.float32) * scale + attn_bias
        m = jnp.max(s, axis=-1, keepdims=True)
        e = jnp.exp(s - m)
        p = e * pl.reciprocal(jnp.sum(e, axis=-1, keepdims=True), approx=True)

        head_out = jnp.dot(p, v_h, preferred_element_type=jnp.float32)   # (BT, dim_head)
        # Fold each head straight through its slice of the output projection.
        attn_out = attn_out + jnp.dot(head_out, wo[h * dim_head:(h + 1) * dim_head, :],
                                      preferred_element_type=jnp.float32)
    x = x + attn_out + bo_ref[...]

    # ---------------- PreNorm feed-forward (GELU MLP) + residual ----------------
    xn2 = _layernorm(x, ln2g_ref[...], ln2b_ref[...])
    h1 = _gelu_tanh(jnp.dot(xn2, w1_ref[...],
                            preferred_element_type=jnp.float32) + b1_ref[...])
    x = x + jnp.dot(h1, w2_ref[...], preferred_element_type=jnp.float32) + b2_ref[...]

    x_sc[...] = x

    @pl.when(l == pl.num_programs(0) - 1)
    def _():
        o_ref[...] = x.astype(o_ref.dtype)


def vit_features(x_img, params, *, patch_size, heads, dim_head):
    """x_img: (B, C, H, W) f32.  Returns (B, num_patches, dim) f32 (ViT minus head)."""
    B, C, H, W = x_img.shape
    p = patch_size
    nh, nw = H // p, W // p
    N = nh * nw
    BT = B * N
    patch_dim = C * p * p
    w_patch = params["w_patch"]
    dim = w_patch.shape[1]
    layers = params["layers"]
    depth = len(layers)
    inner = heads * dim_head
    mlp_dim = layers[0]["w1"].shape[1]

    # einops Rearrange 'b c (h p1) (w p2) -> b (h w) (p1 p2 c)', batch folded into rows.
    patches = (x_img.reshape(B, C, nh, p, nw, p)
               .transpose(0, 2, 4, 3, 5, 1)
               .reshape(BT, patch_dim))

    # Additive bias: flattened-row attention stays block-diagonal per image.
    img_id = jnp.arange(BT, dtype=jnp.int32) // N
    attn_bias = jnp.where(img_id[:, None] == img_id[None, :], 0.0, -1e30).astype(jnp.float32)

    def stk(name, shape):
        return jnp.stack([jnp.reshape(lyr[name], shape) for lyr in layers])

    ln1_g = stk("ln1_g", (1, dim)); ln1_b = stk("ln1_b", (1, dim))
    w_qkv = stk("w_qkv", (dim, 3 * inner))
    w_o = stk("w_o", (inner, dim)); b_o = stk("b_o", (1, dim))
    ln2_g = stk("ln2_g", (1, dim)); ln2_b = stk("ln2_b", (1, dim))
    w1 = stk("w1", (dim, mlp_dim)); b1 = stk("b1", (1, mlp_dim))
    w2 = stk("w2", (mlp_dim, dim)); b2 = stk("b2", (1, dim))

    kernel = functools.partial(_vit_stack_kernel, heads=heads, dim_head=dim_head)

    def const2d(shape):
        return pl.BlockSpec(shape, lambda l: (0, 0))

    def per_layer(shape):
        return pl.BlockSpec((None,) + shape, lambda l: (l, 0, 0))

    out2d = pl.pallas_call(
        kernel,
        out_shape=jax.ShapeDtypeStruct((BT, dim), jnp.float32),
        grid_spec=pltpu.PrefetchScalarGridSpec(
            num_scalar_prefetch=0,
            grid=(depth,),
            in_specs=[
                const2d((BT, patch_dim)),        # patches
                const2d((patch_dim, dim)),       # w_patch
                const2d((1, dim)),               # b_patch
                const2d((BT, BT)),               # attention block-diagonal bias
                per_layer((1, dim)),             # ln1 gamma
                per_layer((1, dim)),             # ln1 beta
                per_layer((dim, 3 * inner)),     # to_qkv (bias=False in ViT)
                per_layer((inner, dim)),         # to_out weight
                per_layer((1, dim)),             # to_out bias
                per_layer((1, dim)),             # ln2 gamma
                per_layer((1, dim)),             # ln2 beta
                per_layer((dim, mlp_dim)),       # ff w1
                per_layer((1, mlp_dim)),         # ff b1
                per_layer((mlp_dim, dim)),       # ff w2
                per_layer((1, dim)),             # ff b2
            ],
            out_specs=pl.BlockSpec((BT, dim), lambda l: (0, 0)),
            scratch_shapes=[pltpu.VMEM((BT, dim), jnp.float32)],
        ),
        compiler_params=pltpu.CompilerParams(dimension_semantics=("arbitrary",)),
    )(patches, w_patch, params["b_patch"], attn_bias,
      ln1_g, ln1_b, w_qkv, w_o, b_o, ln2_g, ln2_b, w1, b1, w2, b2)

    return out2d.reshape(B, N, dim)


def _reference(x_img, params, *, patch_size, heads, dim_head):
    """Pure-JAX reference mirroring Sequential(*ViT.children()[:-1]) in eval mode."""
    B, C, H, W = x_img.shape
    p = patch_size
    nh, nw = H // p, W // p
    N = nh * nw
    patches = (x_img.reshape(B, C, nh, p, nw, p)
               .transpose(0, 2, 4, 3, 5, 1)
               .reshape(B, N, -1))
    x = patches @ params["w_patch"] + params["b_patch"]      # (B, N, dim)
    inner = heads * dim_head
    scale = dim_head ** -0.5

    def ln(t, g, b, eps=1e-5):
        mu = t.mean(-1, keepdims=True)
        var = ((t - mu) ** 2).mean(-1, keepdims=True)
        return (t - mu) / jnp.sqrt(var + eps) * g + b

    for lyr in params["layers"]:
        xn = ln(x, lyr["ln1_g"], lyr["ln1_b"])
        qkv = xn @ lyr["w_qkv"]
        q, k, v = jnp.split(qkv, 3, axis=-1)
        q, k, v = (t.reshape(B, N, heads, dim_head).transpose(0, 2, 1, 3) for t in (q, k, v))
        att = jax.nn.softmax(jnp.einsum("bhqd,bhkd->bhqk", q, k) * scale, axis=-1)
        out = jnp.einsum("bhqk,bhkd->bhqd", att, v)
        out = out.transpose(0, 2, 1, 3).reshape(B, N, inner)
        x = x + out @ lyr["w_o"] + lyr["b_o"]
        xn = ln(x, lyr["ln2_g"], lyr["ln2_b"])
        h1 = jax.nn.gelu(xn @ lyr["w1"] + lyr["b1"], approximate=True)
        x = x + h1 @ lyr["w2"] + lyr["b2"]
    return x


def _init_params(key, *, patch_dim, dim, heads, dim_head, mlp_dim, depth):
    """Deterministic nn.Linear-style init; LayerNorms at PyTorch defaults (1, 0)."""
    inner = heads * dim_head
    keys = iter(jax.random.split(key, 2 + depth * 8))

    def uniform(k, shape, fan_in):
        bound = 1.0 / math.sqrt(fan_in)
        return jax.random.uniform(k, shape, jnp.float32, -bound, bound)

    w_patch = uniform(next(keys), (patch_dim, dim), patch_dim)
    b_patch = uniform(next(keys), (1, dim), patch_dim)
    layers = []
    for _ in range(depth):
        layers.append(dict(
            ln1_g=jnp.ones((dim,), jnp.float32),
            ln1_b=jnp.zeros((dim,), jnp.float32),
            w_qkv=uniform(next(keys), (dim, 3 * inner), dim),
            w_o=uniform(next(keys), (inner, dim), inner),
            b_o=uniform(next(keys), (1, dim), inner),
            ln2_g=jnp.ones((dim,), jnp.float32),
            ln2_b=jnp.zeros((dim,), jnp.float32),
            w1=uniform(next(keys), (dim, mlp_dim), dim),
            b1=uniform(next(keys), (1, mlp_dim), dim),
            w2=uniform(next(keys), (mlp_dim, dim), mlp_dim),
            b2=uniform(next(keys), (1, dim), mlp_dim),
        ))
    return dict(w_patch=w_patch, b_patch=b_patch, layers=layers)


if __name__ == "__main__":
    # Small config consistent with the module: images (B,3,32,32), patch 8 -> 16 patches,
    # dim=32, depth=2, heads=4, dim_head=16 (inner=64), mlp_dim=64.
    B, C, H, W = 2, 3, 32, 32
    patch = 8
    dim, depth, heads, dim_head, mlp_dim = 32, 2, 4, 16, 64
    N = (H // patch) * (W // patch)

    key = jax.random.PRNGKey(0)
    kx, kp = jax.random.split(key)
    x = jax.random.normal(kx, (B, C, H, W), jnp.float32)
    params = _init_params(kp, patch_dim=C * patch * patch, dim=dim, heads=heads,
                          dim_head=dim_head, mlp_dim=mlp_dim, depth=depth)

    out = jax.block_until_ready(
        vit_features(x, params, patch_size=patch, heads=heads, dim_head=dim_head))
    ref = _reference(x, params, patch_size=patch, heads=heads, dim_head=dim_head)

    assert out.shape == (B, N, dim), out.shape
    # Tolerance covers the EUP approximate reciprocal in the softmax denominator.
    assert jnp.allclose(out, ref, atol=1e-2, rtol=1e-2), \
        f"max err {jnp.max(jnp.abs(out - ref))}"

    print("KERNEL_OK")
</pallas_src>

<mosaic_0001>
module attributes {stable_mosaic.version = 11 : i64} {
  func.func @_vit_stack_kernel(%arg0: i32, %arg1: memref<32x192xf32, #tpu.memory_space<vmem>>, %arg2: memref<192x32xf32, #tpu.memory_space<vmem>>, %arg3: memref<1x32xf32, #tpu.memory_space<vmem>>, %arg4: memref<32x32xf32, #tpu.memory_space<vmem>>, %arg5: memref<1x1x32xf32, #tpu.memory_space<vmem>>, %arg6: memref<1x1x32xf32, #tpu.memory_space<vmem>>, %arg7: memref<1x32x192xf32, #tpu.memory_space<vmem>>, %arg8: memref<1x64x32xf32, #tpu.memory_space<vmem>>, %arg9: memref<1x1x32xf32, #tpu.memory_space<vmem>>, %arg10: memref<1x1x32xf32, #tpu.memory_space<vmem>>, %arg11: memref<1x1x32xf32, #tpu.memory_space<vmem>>, %arg12: memref<1x32x64xf32, #tpu.memory_space<vmem>>, %arg13: memref<1x1x64xf32, #tpu.memory_space<vmem>>, %arg14: memref<1x64x32xf32, #tpu.memory_space<vmem>>, %arg15: memref<1x1x32xf32, #tpu.memory_space<vmem>>, %arg16: memref<32x32xf32, #tpu.memory_space<vmem>>, %arg17: memref<32x32xf32, #tpu.memory_space<vmem>>) attributes {dimension_semantics = [#tpu.dimension_semantics<arbitrary>], iteration_bounds = array<i64: 2>, scalar_prefetch = 0 : i64, scratch_operands = 1 : i64, tpu.core_type = #tpu.core_type<tc>, window_params = [{pipeline_mode = #tpu.pipeline_mode<synchronous>, transform_indices = @transform_0, window_bounds = array<i64: 32, 192>}, {pipeline_mode = #tpu.pipeline_mode<synchronous>, transform_indices = @transform_1, window_bounds = array<i64: 192, 32>}, {pipeline_mode = #tpu.pipeline_mode<synchronous>, transform_indices = @transform_2, window_bounds = array<i64: 1, 32>}, {pipeline_mode = #tpu.pipeline_mode<synchronous>, transform_indices = @transform_3, window_bounds = array<i64: 32, 32>}, {transform_indices = @transform_4, window_bounds = array<i64: 1, 1, 32>}, {transform_indices = @transform_5, window_bounds = array<i64: 1, 1, 32>}, {transform_indices = @transform_6, window_bounds = array<i64: 1, 32, 192>}, {transform_indices = @transform_7, window_bounds = array<i64: 1, 64, 32>}, {transform_indices = @transform_8, window_bounds = array<i64: 1, 1, 32>}, {transform_indices = @transform_9, window_bounds = array<i64: 1, 1, 32>}, {transform_indices = @transform_10, window_bounds = array<i64: 1, 1, 32>}, {transform_indices = @transform_11, window_bounds = array<i64: 1, 32, 64>}, {transform_indices = @transform_12, window_bounds = array<i64: 1, 1, 64>}, {transform_indices = @transform_13, window_bounds = array<i64: 1, 64, 32>}, {transform_indices = @transform_14, window_bounds = array<i64: 1, 1, 32>}, {pipeline_mode = #tpu.pipeline_mode<synchronous>, transform_indices = @transform_15, window_bounds = array<i64: 32, 32>}]} {
    %c0_i32 = arith.constant 0 : i32
    %0 = arith.cmpi eq, %arg0, %c0_i32 : i32
    %1 = arith.extui %0 : i1 to i32
    %c0_i32_0 = arith.constant 0 : i32
    %2 = arith.cmpi ne, %1, %c0_i32_0 : i32
    scf.if %2 {
      %c0_81 = arith.constant 0 : index
      %c0_82 = arith.constant 0 : index
      %180 = vector.load %arg1[%c0_81, %c0_82] : memref<32x192xf32, #tpu.memory_space<vmem>>, vector<32x192xf32>
      %c0_83 = arith.constant 0 : index
      %c0_84 = arith.constant 0 : index
      %181 = vector.load %arg2[%c0_83, %c0_84] : memref<192x32xf32, #tpu.memory_space<vmem>>, vector<192x32xf32>
      %cst_85 = arith.constant dense<0.000000e+00> : vector<32x32xf32>
      %182 = tpu.matmul %180, %181, %cst_85 {dimension_numbers = #tpu.dot_dimension_numbers<[1], [0], [0], [1], [0, 0, 1, 1], [], []>} : vector<32x192xf32>, vector<192x32xf32>, vector<32x32xf32> -> vector<32x32xf32>
      %c0_86 = arith.constant 0 : index
      %c0_87 = arith.constant 0 : index
      %183 = vector.load %arg3[%c0_86, %c0_87] : memref<1x32xf32, #tpu.memory_space<vmem>>, vector<1x32xf32>
      %184 = vector.broadcast %183 : vector<1x32xf32> to vector<32x32xf32>
      %185 = arith.addf %182, %184 : vector<32x32xf32>
      %c0_88 = arith.constant 0 : index
      %c0_89 = arith.constant 0 : index
      %186 = vector.load %arg17[%c0_88, %c0_89] : memref<32x32xf32, #tpu.memory_space<vmem>>, vector<32x32xf32>
      tpu.vector_store %arg17[%c0_88, %c0_89], %185 {strides = array<i32>} : memref<32x32xf32, #tpu.memory_space<vmem>>, vector<32x32xf32>,
    } else {
    }
    %c0 = arith.constant 0 : index
    %c0_1 = arith.constant 0 : index
    %3 = vector.load %arg17[%c0, %c0_1] : memref<32x32xf32, #tpu.memory_space<vmem>>, vector<32x32xf32>
    %c0_2 = arith.constant 0 : index
    %c0_3 = arith.constant 0 : index
    %c0_4 = arith.constant 0 : index
    %4 = vector.load %arg5[%c0_2, %c0_3, %c0_4] : memref<1x1x32xf32, #tpu.memory_space<vmem>>, vector<1x1x32xf32>
    %5 = vector.shape_cast %4 : vector<1x1x32xf32> to vector<1x32xf32>
    %c0_5 = arith.constant 0 : index
    %c0_6 = arith.constant 0 : index
    %c0_7 = arith.constant 0 : index
    %6 = vector.load %arg6[%c0_5, %c0_6, %c0_7] : memref<1x1x32xf32, #tpu.memory_space<vmem>>, vector<1x1x32xf32>
    %7 = vector.shape_cast %6 : vector<1x1x32xf32> to vector<1x32xf32>
    %cst = arith.constant dense<0.000000e+00> : vector<32xf32>
    %8 = vector.multi_reduction <add>, %3, %cst [1] : vector<32x32xf32> to vector<32xf32>
    %9 = vector.shape_cast %8 : vector<32xf32> to vector<32x1xf32>
    %cst_8 = arith.constant 3.200000e+01 : f32
    %10 = vector.broadcast %cst_8 : f32 to vector<32x1xf32>
    %11 = arith.divf %9, %10 : vector<32x1xf32>
    %12 = vector.broadcast %11 : vector<32x1xf32> to vector<32x32xf32>
    %13 = arith.subf %3, %12 : vector<32x32xf32>
    %14 = arith.mulf %13, %13 : vector<32x32xf32>
    %cst_9 = arith.constant dense<0.000000e+00> : vector<32xf32>
    %15 = vector.multi_reduction <add>, %14, %cst_9 [1] : vector<32x32xf32> to vector<32xf32>
    %16 = vector.shape_cast %15 : vector<32xf32> to vector<32x1xf32>
    %cst_10 = arith.constant 3.200000e+01 : f32
    %17 = vector.broadcast %cst_10 : f32 to vector<32x1xf32>
    %18 = arith.divf %16, %17 : vector<32x1xf32>
    %cst_11 = arith.constant 9.99999974E-6 : f32
    %19 = vector.broadcast %cst_11 : f32 to vector<32x1xf32>
    %20 = arith.addf %18, %19 : vector<32x1xf32>
    %21 = math.rsqrt %20 : vector<32x1xf32>
    %22 = vector.broadcast %21 : vector<32x1xf32> to vector<32x32xf32>
    %23 = arith.mulf %13, %22 : vector<32x32xf32>
    %24 = vector.broadcast %5 : vector<1x32xf32> to vector<32x32xf32>
    %25 = arith.mulf %23, %24 : vector<32x32xf32>
    %26 = vector.broadcast %7 : vector<1x32xf32> to vector<32x32xf32>
    %27 = arith.addf %25, %26 : vector<32x32xf32>
    %c0_12 = arith.constant 0 : index
    %c0_13 = arith.constant 0 : index
    %c0_14 = arith.constant 0 : index
    %28 = vector.load %arg7[%c0_12, %c0_13, %c0_14] : memref<1x32x192xf32, #tpu.memory_space<vmem>>, vector<1x32x192xf32>
    %29 = vector.shape_cast %28 : vector<1x32x192xf32> to vector<32x192xf32>
    %cst_15 = arith.constant dense<0.000000e+00> : vector<32x192xf32>
    %30 = tpu.matmul %27, %29, %cst_15 {dimension_numbers = #tpu.dot_dimension_numbers<[1], [0], [0], [1], [0, 0, 1, 1], [], []>} : vector<32x32xf32>, vector<32x192xf32>, vector<32x192xf32> -> vector<32x192xf32>
    %c0_16 = arith.constant 0 : index
    %c0_17 = arith.constant 0 : index
    %c0_18 = arith.constant 0 : index
    %31 = vector.load %arg8[%c0_16, %c0_17, %c0_18] : memref<1x64x32xf32, #tpu.memory_space<vmem>>, vector<1x64x32xf32>
    %32 = vector.shape_cast %31 : vector<1x64x32xf32> to vector<64x32xf32>
    %c0_19 = arith.constant 0 : index
    %c0_20 = arith.constant 0 : index
    %33 = vector.load %arg4[%c0_19, %c0_20] : memref<32x32xf32, #tpu.memory_space<vmem>>, vector<32x32xf32>
    %cst_21 = arith.constant 0.000000e+00 : f32
    %34 = vector.broadcast %cst_21 : f32 to vector<32x32xf32>
    %35 = vector.extract_strided_slice %30 {offsets = [0, 0], sizes = [32, 16], strides = [1, 1]} : vector<32x192xf32> to vector<32x16xf32>
    %36 = vector.extract_strided_slice %30 {offsets = [0, 64], sizes = [32, 16], strides = [1, 1]} : vector<32x192xf32> to vector<32x16xf32>
    %37 = vector.extract_strided_slice %30 {offsets = [0, 128], sizes = [32, 16], strides = [1, 1]} : vector<32x192xf32> to vector<32x16xf32>
    %cst_22 = arith.constant dense<0.000000e+00> : vector<32x32xf32>
    %38 = tpu.matmul %35, %36, %cst_22 {dimension_numbers = #tpu.dot_dimension_numbers<[1], [1], [0], [0], [0, 0, 1, 0], [], []>} : vector<32x16xf32>, vector<32x16xf32>, vector<32x32xf32> -> vector<32x32xf32>
    %cst_23 = arith.constant 2.500000e-01 : f32
    %39 = vector.broadcast %cst_23 : f32 to vector<32x32xf32>
    %40 = arith.mulf %38, %39 : vector<32x32xf32>
    %41 = arith.addf %40, %33 : vector<32x32xf32>
    %cst_24 = arith.constant dense<0xFF800000> : vector<32xf32>
    %42 = vector.multi_reduction <maximumf>, %41, %cst_24 [1] : vector<32x32xf32> to vector<32xf32>
    %43 = vector.shape_cast %42 : vector<32xf32> to vector<32x1xf32>
    %44 = vector.broadcast %43 : vector<32x1xf32> to vector<32x32xf32>
    %45 = arith.subf %41, %44 : vector<32x32xf32>
    %46 = math.exp %45 : vector<32x32xf32>
    %cst_25 = arith.constant dense<0.000000e+00> : vector<32xf32>
    %47 = vector.multi_reduction <add>, %46, %cst_25 [1] : vector<32x32xf32> to vector<32xf32>
    %48 = vector.shape_cast %47 : vector<32xf32> to vector<32x1xf32>
    %49 = tpu.reciprocal %48 {approx = true} : vector<32x1xf32> -> vector<32x1xf32>
    %50 = vector.broadcast %49 : vector<32x1xf32> to vector<32x32xf32>
    %51 = arith.mulf %46, %50 : vector<32x32xf32>
    %cst_26 = arith.constant dense<0.000000e+00> : vector<32x16xf32>
    %52 = tpu.matmul %51, %37, %cst_26 {dimension_numbers = #tpu.dot_dimension_numbers<[1], [0], [0], [1], [0, 0, 1, 1], [], []>} : vector<32x32xf32>, vector<32x16xf32>, vector<32x16xf32> -> vector<32x16xf32>
    %53 = vector.extract_strided_slice %32 {offsets = [0, 0], sizes = [16, 32], strides = [1, 1]} : vector<64x32xf32> to vector<16x32xf32>
    %cst_27 = arith.constant dense<0.000000e+00> : vector<32x32xf32>
    %54 = tpu.matmul %52, %53, %cst_27 {dimension_numbers = #tpu.dot_dimension_numbers<[1], [0], [0], [1], [0, 0, 1, 1], [], []>} : vector<32x16xf32>, vector<16x32xf32>, vector<32x32xf32> -> vector<32x32xf32>
    %55 = arith.addf %34, %54 : vector<32x32xf32>
    %56 = vector.extract_strided_slice %30 {offsets = [0, 16], sizes = [32, 16], strides = [1, 1]} : vector<32x192xf32> to vector<32x16xf32>
    %57 = vector.extract_strided_slice %30 {offsets = [0, 80], sizes = [32, 16], strides = [1, 1]} : vector<32x192xf32> to vector<32x16xf32>
    %58 = vector.extract_strided_slice %30 {offsets = [0, 144], sizes = [32, 16], strides = [1, 1]} : vector<32x192xf32> to vector<32x16xf32>
    %cst_28 = arith.constant dense<0.000000e+00> : vector<32x32xf32>
    %59 = tpu.matmul %56, %57, %cst_28 {dimension_numbers = #tpu.dot_dimension_numbers<[1], [1], [0], [0], [0, 0, 1, 0], [], []>} : vector<32x16xf32>, vector<32x16xf32>, vector<32x32xf32> -> vector<32x32xf32>
    %cst_29 = arith.constant 2.500000e-01 : f32
    %60 = vector.broadcast %cst_29 : f32 to vector<32x32xf32>
    %61 = arith.mulf %59, %60 : vector<32x32xf32>
    %62 = arith.addf %61, %33 : vector<32x32xf32>
    %cst_30 = arith.constant dense<0xFF800000> : vector<32xf32>
    %63 = vector.multi_reduction <maximumf>, %62, %cst_30 [1] : vector<32x32xf32> to vector<32xf32>
    %64 = vector.shape_cast %63 : vector<32xf32> to vector<32x1xf32>
    %65 = vector.broadcast %64 : vector<32x1xf32> to vector<32x32xf32>
    %66 = arith.subf %62, %65 : vector<32x32xf32>
    %67 = math.exp %66 : vector<32x32xf32>
    %cst_31 = arith.constant dense<0.000000e+00> : vector<32xf32>
    %68 = vector.multi_reduction <add>, %67, %cst_31 [1] : vector<32x32xf32> to vector<32xf32>
    %69 = vector.shape_cast %68 : vector<32xf32> to vector<32x1xf32>
    %70 = tpu.reciprocal %69 {approx = true} : vector<32x1xf32> -> vector<32x1xf32>
    %71 = vector.broadcast %70 : vector<32x1xf32> to vector<32x32xf32>
    %72 = arith.mulf %67, %71 : vector<32x32xf32>
    %cst_32 = arith.constant dense<0.000000e+00> : vector<32x16xf32>
    %73 = tpu.matmul %72, %58, %cst_32 {dimension_numbers = #tpu.dot_dimension_numbers<[1], [0], [0], [1], [0, 0, 1, 1], [], []>} : vector<32x32xf32>, vector<32x16xf32>, vector<32x16xf32> -> vector<32x16xf32>
    %74 = vector.extract_strided_slice %32 {offsets = [16, 0], sizes = [16, 32], strides = [1, 1]} : vector<64x32xf32> to vector<16x32xf32>
    %cst_33 = arith.constant dense<0.000000e+00> : vector<32x32xf32>
    %75 = tpu.matmul %73, %74, %cst_33 {dimension_numbers = #tpu.dot_dimension_numbers<[1], [0], [0], [1], [0, 0, 1, 1], [], []>} : vector<32x16xf32>, vector<16x32xf32>, vector<32x32xf32> -> vector<32x32xf32>
    %76 = arith.addf %55, %75 : vector<32x32xf32>
    %77 = vector.extract_strided_slice %30 {offsets = [0, 32], sizes = [32, 16], strides = [1, 1]} : vector<32x192xf32> to vector<32x16xf32>
    %78 = vector.extract_strided_slice %30 {offsets = [0, 96], sizes = [32, 16], strides = [1, 1]} : vector<32x192xf32> to vector<32x16xf32>
    %79 = vector.extract_strided_slice %30 {offsets = [0, 160], sizes = [32, 16], strides = [1, 1]} : vector<32x192xf32> to vector<32x16xf32>
    %cst_34 = arith.constant dense<0.000000e+00> : vector<32x32xf32>
    %80 = tpu.matmul %77, %78, %cst_34 {dimension_numbers = #tpu.dot_dimension_numbers<[1], [1], [0], [0], [0, 0, 1, 0], [], []>} : vector<32x16xf32>, vector<32x16xf32>, vector<32x32xf32> -> vector<32x32xf32>
    %cst_35 = arith.constant 2.500000e-01 : f32
    %81 = vector.broadcast %cst_35 : f32 to vector<32x32xf32>
    %82 = arith.mulf %80, %81 : vector<32x32xf32>
    %83 = arith.addf %82, %33 : vector<32x32xf32>
    %cst_36 = arith.constant dense<0xFF800000> : vector<32xf32>
    %84 = vector.multi_reduction <maximumf>, %83, %cst_36 [1] : vector<32x32xf32> to vector<32xf32>
    %85 = vector.shape_cast %84 : vector<32xf32> to vector<32x1xf32>
    %86 = vector.broadcast %85 : vector<32x1xf32> to vector<32x32xf32>
    %87 = arith.subf %83, %86 : vector<32x32xf32>
    %88 = math.exp %87 : vector<32x32xf32>
    %cst_37 = arith.constant dense<0.000000e+00> : vector<32xf32>
    %89 = vector.multi_reduction <add>, %88, %cst_37 [1] : vector<32x32xf32> to vector<32xf32>
    %90 = vector.shape_cast %89 : vector<32xf32> to vector<32x1xf32>
    %91 = tpu.reciprocal %90 {approx = true} : vector<32x1xf32> -> vector<32x1xf32>
    %92 = vector.broadcast %91 : vector<32x1xf32> to vector<32x32xf32>
    %93 = arith.mulf %88, %92 : vector<32x32xf32>
    %cst_38 = arith.constant dense<0.000000e+00> : vector<32x16xf32>
    %94 = tpu.matmul %93, %79, %cst_38 {dimension_numbers = #tpu.dot_dimension_numbers<[1], [0], [0], [1], [0, 0, 1, 1], [], []>} : vector<32x32xf32>, vector<32x16xf32>, vector<32x16xf32> -> vector<32x16xf32>
    %95 = vector.extract_strided_slice %32 {offsets = [32, 0], sizes = [16, 32], strides = [1, 1]} : vector<64x32xf32> to vector<16x32xf32>
    %cst_39 = arith.constant dense<0.000000e+00> : vector<32x32xf32>
    %96 = tpu.matmul %94, %95, %cst_39 {dimension_numbers = #tpu.dot_dimension_numbers<[1], [0], [0], [1], [0, 0, 1, 1], [], []>} : vector<32x16xf32>, vector<16x32xf32>, vector<32x32xf32> -> vector<32x32xf32>
    %97 = arith.addf %76, %96 : vector<32x32xf32>
    %98 = vector.extract_strided_slice %30 {offsets = [0, 48], sizes = [32, 16], strides = [1, 1]} : vector<32x192xf32> to vector<32x16xf32>
    %99 = vector.extract_strided_slice %30 {offsets = [0, 112], sizes = [32, 16], strides = [1, 1]} : vector<32x192xf32> to vector<32x16xf32>
    %100 = vector.extract_strided_slice %30 {offsets = [0, 176], sizes = [32, 16], strides = [1, 1]} : vector<32x192xf32> to vector<32x16xf32>
    %cst_40 = arith.constant dense<0.000000e+00> : vector<32x32xf32>
    %101 = tpu.matmul %98, %99, %cst_40 {dimension_numbers = #tpu.dot_dimension_numbers<[1], [1], [0], [0], [0, 0, 1, 0], [], []>} : vector<32x16xf32>, vector<32x16xf32>, vector<32x32xf32> -> vector<32x32xf32>
    %cst_41 = arith.constant 2.500000e-01 : f32
    %102 = vector.broadcast %cst_41 : f32 to vector<32x32xf32>
    %103 = arith.mulf %101, %102 : vector<32x32xf32>
    %104 = arith.addf %103, %33 : vector<32x32xf32>
    %cst_42 = arith.constant dense<0xFF800000> : vector<32xf32>
    %105 = vector.multi_reduction <maximumf>, %104, %cst_42 [1] : vector<32x32xf32> to vector<32xf32>
    %106 = vector.shape_cast %105 : vector<32xf32> to vector<32x1xf32>
    %107 = vector.broadcast %106 : vector<32x1xf32> to vector<32x32xf32>
    %108 = arith.subf %104, %107 : vector<32x32xf32>
    %109 = math.exp %108 : vector<32x32xf32>
    %cst_43 = arith.constant dense<0.000000e+00> : vector<32xf32>
    %110 = vector.multi_reduction <add>, %109, %cst_43 [1] : vector<32x32xf32> to vector<32xf32>
    %111 = vector.shape_cast %110 : vector<32xf32> to vector<32x1xf32>
    %112 = tpu.reciprocal %111 {approx = true} : vector<32x1xf32> -> vector<32x1xf32>
    %113 = vector.broadcast %112 : vector<32x1xf32> to vector<32x32xf32>
    %114 = arith.mulf %109, %113 : vector<32x32xf32>
    %cst_44 = arith.constant dense<0.000000e+00> : vector<32x16xf32>
    %115 = tpu.matmul %114, %100, %cst_44 {dimension_numbers = #tpu.dot_dimension_numbers<[1], [0], [0], [1], [0, 0, 1, 1], [], []>} : vector<32x32xf32>, vector<32x16xf32>, vector<32x16xf32> -> vector<32x16xf32>
    %116 = vector.extract_strided_slice %32 {offsets = [48, 0], sizes = [16, 32], strides = [1, 1]} : vector<64x32xf32> to vector<16x32xf32>
    %cst_45 = arith.constant dense<0.000000e+00> : vector<32x32xf32>
    %117 = tpu.matmul %115, %116, %cst_45 {dimension_numbers = #tpu.dot_dimension_numbers<[1], [0], [0], [1], [0, 0, 1, 1], [], []>} : vector<32x16xf32>, vector<16x32xf32>, vector<32x32xf32> -> vector<32x32xf32>
    %118 = arith.addf %97, %117 : vector<32x32xf32>
    %119 = arith.addf %3, %118 : vector<32x32xf32>
    %c0_46 = arith.constant 0 : index
    %c0_47 = arith.constant 0 : index
    %c0_48 = arith.constant 0 : index
    %120 = vector.load %arg9[%c0_46, %c0_47, %c0_48] : memref<1x1x32xf32, #tpu.memory_space<vmem>>, vector<1x1x32xf32>
    %121 = vector.shape_cast %120 : vector<1x1x32xf32> to vector<1x32xf32>
    %122 = vector.broadcast %121 : vector<1x32xf32> to vector<32x32xf32>
    %123 = arith.addf %119, %122 : vector<32x32xf32>
    %c0_49 = arith.constant 0 : index
    %c0_50 = arith.constant 0 : index
    %c0_51 = arith.constant 0 : index
    %124 = vector.load %arg10[%c0_49, %c0_50, %c0_51] : memref<1x1x32xf32, #tpu.memory_space<vmem>>, vector<1x1x32xf32>
    %125 = vector.shape_cast %124 : vector<1x1x32xf32> to vector<1x32xf32>
    %c0_52 = arith.constant 0 : index
    %c0_53 = arith.constant 0 : index
    %c0_54 = arith.constant 0 : index
    %126 = vector.load %arg11[%c0_52, %c0_53, %c0_54] : memref<1x1x32xf32, #tpu.memory_space<vmem>>, vector<1x1x32xf32>
    %127 = vector.shape_cast %126 : vector<1x1x32xf32> to vector<1x32xf32>
    %cst_55 = arith.constant dense<0.000000e+00> : vector<32xf32>
    %128 = vector.multi_reduction <add>, %123, %cst_55 [1] : vector<32x32xf32> to vector<32xf32>
    %129 = vector.shape_cast %128 : vector<32xf32> to vector<32x1xf32>
    %cst_56 = arith.constant 3.200000e+01 : f32
    %130 = vector.broadcast %cst_56 : f32 to vector<32x1xf32>
    %131 = arith.divf %129, %130 : vector<32x1xf32>
    %132 = vector.broadcast %131 : vector<32x1xf32> to vector<32x32xf32>
    %133 = arith.subf %123, %132 : vector<32x32xf32>
    %134 = arith.mulf %133, %133 : vector<32x32xf32>
    %cst_57 = arith.constant dense<0.000000e+00> : vector<32xf32>
    %135 = vector.multi_reduction <add>, %134, %cst_57 [1] : vector<32x32xf32> to vector<32xf32>
    %136 = vector.shape_cast %135 : vector<32xf32> to vector<32x1xf32>
    %cst_58 = arith.constant 3.200000e+01 : f32
    %137 = vector.broadcast %cst_58 : f32 to vector<32x1xf32>
    %138 = arith.divf %136, %137 : vector<32x1xf32>
    %cst_59 = arith.constant 9.99999974E-6 : f32
    %139 = vector.broadcast %cst_59 : f32 to vector<32x1xf32>
    %140 = arith.addf %138, %139 : vector<32x1xf32>
    %141 = math.rsqrt %140 : vector<32x1xf32>
    %142 = vector.broadcast %141 : vector<32x1xf32> to vector<32x32xf32>
    %143 = arith.mulf %133, %142 : vector<32x32xf32>
    %144 = vector.broadcast %125 : vector<1x32xf32> to vector<32x32xf32>
    %145 = arith.mulf %143, %144 : vector<32x32xf32>
    %146 = vector.broadcast %127 : vector<1x32xf32> to vector<32x32xf32>
    %147 = arith.addf %145, %146 : vector<32x32xf32>
    %c0_60 = arith.constant 0 : index
    %c0_61 = arith.constant 0 : index
    %c0_62 = arith.constant 0 : index
    %148 = vector.load %arg12[%c0_60, %c0_61, %c0_62] : memref<1x32x64xf32, #tpu.memory_space<vmem>>, vector<1x32x64xf32>
    %149 = vector.shape_cast %148 : vector<1x32x64xf32> to vector<32x64xf32>
    %cst_63 = arith.constant dense<0.000000e+00> : vector<32x64xf32>
    %150 = tpu.matmul %147, %149, %cst_63 {dimension_numbers = #tpu.dot_dimension_numbers<[1], [0], [0], [1], [0, 0, 1, 1], [], []>} : vector<32x32xf32>, vector<32x64xf32>, vector<32x64xf32> -> vector<32x64xf32>
    %c0_64 = arith.constant 0 : index
    %c0_65 = arith.constant 0 : index
    %c0_66 = arith.constant 0 : index
    %151 = vector.load %arg13[%c0_64, %c0_65, %c0_66] : memref<1x1x64xf32, #tpu.memory_space<vmem>>, vector<1x1x64xf32>
    %152 = vector.shape_cast %151 : vector<1x1x64xf32> to vector<1x64xf32>
    %153 = vector.broadcast %152 : vector<1x64xf32> to vector<32x64xf32>
    %154 = arith.addf %150, %153 : vector<32x64xf32>
    %cst_67 = arith.constant 5.000000e-01 : f32
    %155 = vector.broadcast %cst_67 : f32 to vector<32x64xf32>
    %156 = arith.mulf %155, %154 : vector<32x64xf32>
    %cst_68 = arith.constant 4.471500e-02 : f32
    %157 = vector.broadcast %cst_68 : f32 to vector<32x64xf32>
    %158 = arith.mulf %157, %154 : vector<32x64xf32>
    %159 = arith.mulf %158, %154 : vector<32x64xf32>
    %160 = arith.mulf %159, %154 : vector<32x64xf32>
    %161 = arith.addf %154, %160 : vector<32x64xf32>
    %cst_69 = arith.constant 0.797884583 : f32
    %162 = vector.broadcast %cst_69 : f32 to vector<32x64xf32>
    %163 = arith.mulf %162, %161 : vector<32x64xf32>
    %164 = math.tanh %163 : vector<32x64xf32>
    %cst_70 = arith.constant 1.000000e+00 : f32
    %165 = vector.broadcast %cst_70 : f32 to vector<32x64xf32>
    %166 = arith.addf %165, %164 : vector<32x64xf32>
    %167 = arith.mulf %156, %166 : vector<32x64xf32>
    %c0_71 = arith.constant 0 : index
    %c0_72 = arith.constant 0 : index
    %c0_73 = arith.constant 0 : index
    %168 = vector.load %arg14[%c0_71, %c0_72, %c0_73] : memref<1x64x32xf32, #tpu.memory_space<vmem>>, vector<1x64x32xf32>
    %169 = vector.shape_cast %168 : vector<1x64x32xf32> to vector<64x32xf32>
    %cst_74 = arith.constant dense<0.000000e+00> : vector<32x32xf32>
    %170 = tpu.matmul %167, %169, %cst_74 {dimension_numbers = #tpu.dot_dimension_numbers<[1], [0], [0], [1], [0, 0, 1, 1], [], []>} : vector<32x64xf32>, vector<64x32xf32>, vector<32x32xf32> -> vector<32x32xf32>
    %171 = arith.addf %123, %170 : vector<32x32xf32>
    %c0_75 = arith.constant 0 : index
    %c0_76 = arith.constant 0 : index
    %c0_77 = arith.constant 0 : index
    %172 = vector.load %arg15[%c0_75, %c0_76, %c0_77] : memref<1x1x32xf32, #tpu.memory_space<vmem>>, vector<1x1x32xf32>
    %173 = vector.shape_cast %172 : vector<1x1x32xf32> to vector<1x32xf32>
    %174 = vector.broadcast %173 : vector<1x32xf32> to vector<32x32xf32>
    %175 = arith.addf %171, %174 : vector<32x32xf32>
    %c0_78 = arith.constant 0 : index
    %c0_79 = arith.constant 0 : index
    %176 = vector.load %arg17[%c0_78, %c0_79] : memref<32x32xf32, #tpu.memory_space<vmem>>, vector<32x32xf32>
    tpu.vector_store %arg17[%c0_78, %c0_79], %175 {strides = array<i32>} : memref<32x32xf32, #tpu.memory_space<vmem>>, vector<32x32xf32>,
    %c1_i32 = arith.constant 1 : i32
    %177 = arith.cmpi eq, %arg0, %c1_i32 : i32
    %178 = arith.extui %177 : i1 to i32
    %c0_i32_80 = arith.constant 0 : i32
    %179 = arith.cmpi ne, %178, %c0_i32_80 : i32
    scf.if %179 {
      %c0_81 = arith.constant 0 : index
      %c0_82 = arith.constant 0 : index
      %180 = vector.load %arg16[%c0_81, %c0_82] : memref<32x32xf32, #tpu.memory_space<vmem>>, vector<32x32xf32>
      tpu.vector_store %arg16[%c0_81, %c0_82], %175 {strides = array<i32>} : memref<32x32xf32, #tpu.memory_space<vmem>>, vector<32x32xf32>,
    } else {
    }
    return
  }
  func.func @transform_0(%arg0: i32) -> (i32, i32) {
    %c0_i32 = arith.constant 0 : i32
    %c0_i32_0 = arith.constant 0 : i32
    %c0_i32_1 = arith.constant 0 : i32
    return %c0_i32, %c0_i32_0 : i32, i32
  }
  func.func @transform_1(%arg0: i32) -> (i32, i32) {
    %c0_i32 = arith.constant 0 : i32
    %c0_i32_0 = arith.constant 0 : i32
    %c0_i32_1 = arith.constant 0 : i32
    return %c0_i32, %c0_i32_0 : i32, i32
  }
  func.func @transform_2(%arg0: i32) -> (i32, i32) {
    %c0_i32 = arith.constant 0 : i32
    %c0_i32_0 = arith.constant 0 : i32
    %c0_i32_1 = arith.constant 0 : i32
    return %c0_i32, %c0_i32_0 : i32, i32
  }
  func.func @transform_3(%arg0: i32) -> (i32, i32) {
    %c0_i32 = arith.constant 0 : i32
    %c0_i32_0 = arith.constant 0 : i32
    %c0_i32_1 = arith.constant 0 : i32
    return %c0_i32, %c0_i32_0 : i32, i32
  }
  func.func @transform_4(%arg0: i32) -> (i32, i32, i32) {
    %c0_i32 = arith.constant 0 : i32
    %c0_i32_0 = arith.constant 0 : i32
    %c0_i32_1 = arith.constant 0 : i32
    return %arg0, %c0_i32, %c0_i32_0 : i32, i32, i32
  }
  func.func @transform_5(%arg0: i32) -> (i32, i32, i32) {
    %c0_i32 = arith.constant 0 : i32
    %c0_i32_0 = arith.constant 0 : i32
    %c0_i32_1 = arith.constant 0 : i32
    return %arg0, %c0_i32, %c0_i32_0 : i32, i32, i32
  }
  func.func @transform_6(%arg0: i32) -> (i32, i32, i32) {
    %c0_i32 = arith.constant 0 : i32
    %c0_i32_0 = arith.constant 0 : i32
    %c0_i32_1 = arith.constant 0 : i32
    return %arg0, %c0_i32, %c0_i32_0 : i32, i32, i32
  }
  func.func @transform_7(%arg0: i32) -> (i32, i32, i32) {
    %c0_i32 = arith.constant 0 : i32
    %c0_i32_0 = arith.constant 0 : i32
    %c0_i32_1 = arith.constant 0 : i32
    return %arg0, %c0_i32, %c0_i32_0 : i32, i32, i32
  }
  func.func @transform_8(%arg0: i32) -> (i32, i32, i32) {
    %c0_i32 = arith.constant 0 : i32
    %c0_i32_0 = arith.constant 0 : i32
    %c0_i32_1 = arith.constant 0 : i32
    return %arg0, %c0_i32, %c0_i32_0 : i32, i32, i32
  }
  func.func @transform_9(%arg0: i32) -> (i32, i32, i32) {
    %c0_i32 = arith.constant 0 : i32
    %c0_i32_0 = arith.constant 0 : i32
    %c0_i32_1 = arith.constant 0 : i32
    return %arg0, %c0_i32, %c0_i32_0 : i32, i32, i32
  }
  func.func @transform_10(%arg0: i32) -> (i32, i32, i32) {
    %c0_i32 = arith.constant 0 : i32
    %c0_i32_0 = arith.constant 0 : i32
    %c0_i32_1 = arith.constant 0 : i32
    return %arg0, %c0_i32, %c0_i32_0 : i32, i32, i32
  }
  func.func @transform_11(%arg0: i32) -> (i32, i32, i32) {
    %c0_i32 = arith.constant 0 : i32
    %c0_i32_0 = arith.constant 0 : i32
    %c0_i32_1 = arith.constant 0 : i32
    return %arg0, %c0_i32, %c0_i32_0 : i32, i32, i32
  }
  func.func @transform_12(%arg0: i32) -> (i32, i32, i32) {
    %c0_i32 = arith.constant 0 : i32
    %c0_i32_0 = arith.constant 0 : i32
    %c0_i32_1 = arith.constant 0 : i32
    return %arg0, %c0_i32, %c0_i32_0 : i32, i32, i32
  }
  func.func @transform_13(%arg0: i32) -> (i32, i32, i32) {
    %c0_i32 = arith.constant 0 : i32
    %c0_i32_0 = arith.constant 0 : i32
    %c0_i32_1 = arith.constant 0 : i32
    return %arg0, %c0_i32, %c0_i32_0 : i32, i32, i32
  }
  func.func @transform_14(%arg0: i32) -> (i32, i32, i32) {
    %c0_i32 = arith.constant 0 : i32
    %c0_i32_0 = arith.constant 0 : i32
    %c0_i32_1 = arith.constant 0 : i32
    return %arg0, %c0_i32, %c0_i32_0 : i32, i32, i32
  }
  func.func @transform_15(%arg0: i32) -> (i32, i32) {
    %c0_i32 = arith.constant 0 : i32
    %c0_i32_0 = arith.constant 0 : i32
    %c0_i32_1 = arith.constant 0 : i32
    return %c0_i32, %c0_i32_0 : i32, i32
  }
}

</mosaic_0001>

<bundles_post_ra>
// kernel: tpu_custom_call.1
= control target key start
LH: loop header
LB: loop body
LE: loop exit
PB: predicated region body
PF: predicated region fallthrough
CT: control target
= control target key end

     0   :  { %s4323_s0 = inlined_call_operand.vmem [shape: f32[32,192], index: 0, kind: input, shape index: {}]   ;;  %s4324_s1 = inlined_call_operand.vmem [shape: f32[192,32], index: 1, kind: input, shape index: {}]   ;;  %s4325_s2 = inlined_call_operand.vmem [shape: f32[1,32], index: 2, kind: input, shape index: {}]   ;;  %s4326_s3 = inlined_call_operand.vmem [shape: f32[32,32], index: 3, kind: input, shape index: {}]   ;;  %s4327_s4 = inlined_call_operand.vmem [shape: f32[2,1,32], index: 4, kind: input, shape index: {}]   ;;  %s4328_s5 = inlined_call_operand.vmem [shape: f32[2,1,32], index: 5, kind: input, shape index: {}]   ;;  %s4329_s6 = inlined_call_operand.vmem [shape: f32[2,32,192], index: 6, kind: input, shape index: {}]   ;;  %s4330_s7 = inlined_call_operand.vmem [shape: f32[2,64,32], index: 7, kind: input, shape index: {}]   ;;  %s4331_s8 = inlined_call_operand.vmem [shape: f32[2,1,32], index: 8, kind: input, shape index: {}]   ;;  %s4332_s9 = inlined_call_operand.vmem [shape: f32[2,1,32], index: 9, kind: input, shape index: {}]   ;;  %s4333_s10 = inlined_call_operand.vmem [shape: f32[2,1,32], index: 10, kind: input, shape index: {}]   ;;  %s4334_s11 = inlined_call_operand.vmem [shape: f32[2,32,64], index: 11, kind: input, shape index: {}]   ;;  %s4335_s12 = inlined_call_operand.vmem [shape: f32[2,1,64], index: 12, kind: input, shape index: {}]   ;;  %s4336_s13 = inlined_call_operand.vmem [shape: f32[2,64,32], index: 13, kind: input, shape index: {}]   ;;  %s4337_s14 = inlined_call_operand.vmem [shape: f32[2,1,32], index: 14, kind: input, shape index: {}]   ;;  %s4338_s15 = inlined_call_operand.hbm [shape: f32[32,32], index: 15, kind: output, shape index: {}]  }
   0x1   :  { %4341 = sst [smem:[#allocation7_spill]] %s4326_s3 }
   0x2   :  { %4342 = sst [smem:[#allocation8_spill]] %s4328_s5 }
   0x3   :  { %4343 = sst [smem:[#allocation9_spill]] %s4329_s6 }
   0x4   :  { %4344 = sst [smem:[#allocation10_spill]] %s4330_s7 }
   0x5   :  { %4345 = sst [smem:[#allocation11_spill]] %s4331_s8 }
   0x6   :  { %4346 = sst [smem:[#allocation12_spill]] %s4338_s15 }
   0x7   :  { %20 = vsyncpa [#allocation4], 0  ;;  %s3696_s18 = smov 0  }
   0x8 LB: > { %4347 = sst [smem:[#allocation6_spill]] %s3602_s18  ;;  %s3702_s19 = sadd.s32 4294967295, %s3602_s18   ;;  %s3602_s18 = sphi %s3696_s18, %s26_s18  }
   0x9   : > { %p2999_p0 = scmp.ge.s32.totalorder %s3602_s18, 1  ;;  %p519_p1 = scmp.lt.s32.totalorder %s3602_s18, 3 }
   0xb   : > { %p520_p2 = pnand %p2999_p0, %p519_p1 }
   0xc   : > { %p598_p3 = scmp.lt.s32.totalorder (!%p520_p2), %s3702_s19, 1  ;;  %s4350_s6 = sld [smem:[#allocation9_spill]] (!%p520_p2) }
   0xd   : > { %523 = sbr.rel (%p520_p2) target bundleno = 3569 (0xdf1), region = 80  ;;  %s4351_s7 = sld [smem:[#allocation10_spill]] (!%p520_p2) }
   0xe   : > { %p3008_p4 = scmp.ne.s32.totalorder (!%p520_p2), %s3702_s19, 0 }
  0x12   : > { %s3708_s20 = scalar_select %p598_p3, %s3702_s19, 1 }
  0x14   : > { %s3102_s27 = sshll.u32 %s3708_s20, 6  ;;  %s619_s24 = scalar_lea.vmem %s4332_s9, %s3708_s20 }
  0x15   : > { %s3726_s21 = scalar_lea.vmem %s4350_s6, %s3102_s27  ;;  %s3731_s15 = scalar_lea.vmem %s4351_s7, %s3102_s27 }
  0x16   : > { %s622_s5 = scalar_lea.vmem %s4333_s10, %s3708_s20  ;;  %s3104_s28 = sshll.u32 %s3708_s20, 5 }
  0x17   : > { %s630_s16 = scalar_lea.vmem %s4335_s12, %s3708_s20  ;;  %s3749_s8 = scalar_lea.vmem %s4334_s11, %s3104_s28 }
  0x18   : > { %s3754_s7 = scalar_lea.vmem %s4336_s13, %s3102_s27  ;;  %s638_s26 = scalar_lea.vmem %s4337_s14, %s3708_s20 }
  0x19   : > { %642 = sbr.rel (%p3008_p4) target bundleno = 280 (0x118), region = 84 }
  0x1e   : > { %v666_v0 = vld [vmem:[%s4324_s1 + $0x78] sm:$0xff]  ;;  %v3604_v1 = vmov 0.0   ;;  %v665_v2 = vld [vmem:[%s4324_s1 + $0x70] sm:$0xff]  ;;  %v664_v3 = vld [vmem:[%s4324_s1 + $0x68] sm:$0xff]  ;;  %vm682_vm0 = vcmask 523264   ;;  %vm780_vm1 = vcmask 261120  }
  0x1f   : > { %695 = vmatprep.subr.mxu0 %v3604_v1  ;;  %3402 = vmatprep.subr.mxu1 %v3604_v1  ;;  %v663_v4 = vld [vmem:[%s4324_s1 + $0x60] sm:$0xff]  ;;  %v662_v5 = vld [vmem:[%s4324_s1 + $0x58] sm:$0xff]  ;;  %v661_v6 = vld [vmem:[%s4324_s1 + $0x50] sm:$0xff] }
  0x20   : > { %696 = vmatpush1.msra.mxu0 %v666_v0  ;;  %3426 = vmatpush1.msra.mxu1 %v666_v0  ;;  %v660_v7 = vld [vmem:[%s4324_s1 + $0x48] sm:$0xff]  ;;  %v659_v8 = vld [vmem:[%s4324_s1 + $0x40] sm:$0xff]  ;;  %v658_v9 = vld [vmem:[%s4324_s1 + $0x38] sm:$0xff] }
  0x21   : > { %697 = vmatprep.subr.mxu0 %v3604_v1  ;;  %3403 = vmatprep.subr.mxu1 %v3604_v1  ;;  %v657_v10 = vld [vmem:[%s4324_s1 + $0x30] sm:$0xff]  ;;  %v656_v11 = vld [vmem:[%s4324_s1 + $0x28] sm:$0xff]  ;;  %v655_v12 = vld [vmem:[%s4324_s1 + $0x20] sm:$0xff] }
  0x22   : > { %698 = vmatpush1.msra.mxu0 %v665_v2  ;;  %3427 = vmatpush1.msra.mxu1 %v665_v2  ;;  %v654_v13 = vld [vmem:[%s4324_s1 + $0x18] sm:$0xff]  ;;  %v653_v14 = vld [vmem:[%s4324_s1 + $0x10] sm:$0xff]  ;;  %v652_v15 = vld [vmem:[%s4324_s1 + $0x8] sm:$0xff] }
  0x23   : > { %699 = vmatprep.subr.mxu0 %v3604_v1  ;;  %3404 = vmatprep.subr.mxu1 %v3604_v1  ;;  %v651_v16 = vld [vmem:[%s4324_s1] sm:$0xff]  ;;  %v674_v17 = vld [vmem:[%s4324_s1 + $0xb8] sm:$0xff]  ;;  %v673_v18 = vld [vmem:[%s4324_s1 + $0xb0] sm:$0xff] }
  0x24   : > { %700 = vmatpush1.msra.mxu0 %v664_v3  ;;  %3428 = vmatpush1.msra.mxu1 %v664_v3  ;;  %v672_v19 = vld [vmem:[%s4324_s1 + $0xa8] sm:$0xff]  ;;  %v671_v20 = vld [vmem:[%s4324_s1 + $0xa0] sm:$0xff]  ;;  %v670_v21 = vld [vmem:[%s4324_s1 + $0x98] sm:$0xff] }
  0x25   : > { %701 = vmatprep.subr.mxu0 %v3604_v1  ;;  %3405 = vmatprep.subr.mxu1 %v3604_v1  ;;  %v669_v22 = vld [vmem:[%s4324_s1 + $0x90] sm:$0xff]  ;;  %v668_v23 = vld [vmem:[%s4324_s1 + $0x88] sm:$0xff]  ;;  %v667_v24 = vld [vmem:[%s4324_s1 + $0x80] sm:$0xff] }
  0x26   : > { %702 = vmatpush1.msra.mxu0 %v663_v4  ;;  %3429 = vmatpush1.msra.mxu1 %v663_v4  ;;  %v644_v25 = vld [vmem:[%s4323_s0 + $0x8] sm:$0xff]  ;;  %v643_v27 = vld [vmem:[%s4323_s0] sm:$0xff]  ;;  %v646_v29 = vld [vmem:[%s4323_s0 + $0x18] sm:$0xff] }
  0x27   : > { %703 = vmatprep.subr.mxu0 %v3604_v1  ;;  %3406 = vmatprep.subr.mxu1 %v3604_v1  ;;  %v648_v26 = vld [vmem:[%s4323_s0 + $0x28] sm:$0xff]  ;;  %v647_v28 = vld [vmem:[%s4323_s0 + $0x20] sm:$0xff]  ;;  %v650_v30 = vld [vmem:[%s4323_s0 + $0x38] sm:$0xff] }
  0x28   : > { %704 = vmatpush1.msra.mxu0 %v662_v5  ;;  %3430 = vmatpush1.msra.mxu1 %v662_v5  ;;  %v645_v31 = vld [vmem:[%s4323_s0 + $0x10] sm:$0xff]  ;;  %v3009_v33 = vld [vmem:[%s4325_s2] ss:$0 sm:$0xff] }
  0x29   : > { %705 = vmatprep.subr.mxu0 %v3604_v1  ;;  %3407 = vmatprep.subr.mxu1 %v3604_v1  ;;  %v649_v32 = vld [vmem:[%s4323_s0 + $0x30] sm:$0xff] }
  0x2a   : > { %706 = vmatpush1.msra.mxu0 %v661_v6  ;;  %3431 = vmatpush1.msra.mxu1 %v661_v6 }
  0x2b   : > { %707 = vmatprep.subr.mxu0 %v3604_v1  ;;  %3408 = vmatprep.subr.mxu1 %v3604_v1 }
  0x2c   : > { %708 = vmatpush1.msra.mxu0 %v660_v7  ;;  %3432 = vmatpush1.msra.mxu1 %v660_v7 }
  0x2d   : > { %709 = vmatprep.subr.mxu0 %v3604_v1  ;;  %3409 = vmatprep.subr.mxu1 %v3604_v1 }
  0x2e   : > { %710 = vmatpush1.msra.mxu0 %v659_v8  ;;  %3433 = vmatpush1.msra.mxu1 %v659_v8 }
  0x2f   : > { %711 = vmatprep.subr.mxu0 %v3604_v1  ;;  %3410 = vmatprep.subr.mxu1 %v3604_v1 }
  0x30   : > { %712 = vmatpush1.msra.mxu0 %v658_v9  ;;  %3434 = vmatpush1.msra.mxu1 %v658_v9 }
  0x31   : > { %713 = vmatprep.subr.mxu0 %v3604_v1  ;;  %3411 = vmatprep.subr.mxu1 %v3604_v1 }
  0x32   : > { %714 = vmatpush1.msra.mxu0 %v657_v10  ;;  %3435 = vmatpush1.msra.mxu1 %v657_v10 }
  0x33   : > { %715 = vmatprep.subr.mxu0 %v3604_v1  ;;  %3412 = vmatprep.subr.mxu1 %v3604_v1 }
  0x34   : > { %716 = vmatpush1.msra.mxu0 %v656_v11  ;;  %3436 = vmatpush1.msra.mxu1 %v656_v11 }
  0x35   : > { %717 = vmatprep.subr.mxu0 %v3604_v1  ;;  %3413 = vmatprep.subr.mxu1 %v3604_v1 }
  0x36   : > { %718 = vmatpush1.msra.mxu0 %v655_v12  ;;  %3437 = vmatpush1.msra.mxu1 %v655_v12 }
  0x37   : > { %719 = vmatprep.subr.mxu0 %v3604_v1  ;;  %3414 = vmatprep.subr.mxu1 %v3604_v1 }
  0x38   : > { %720 = vmatpush1.msra.mxu0 %v654_v13  ;;  %3438 = vmatpush1.msra.mxu1 %v654_v13 }
  0x39   : > { %721 = vmatprep.subr.mxu0 %v3604_v1  ;;  %3415 = vmatprep.subr.mxu1 %v3604_v1 }
  0x3a   : > { %722 = vmatpush1.msra.mxu0 %v653_v14  ;;  %3439 = vmatpush1.msra.mxu1 %v653_v14 }
  0x3b   : > { %723 = vmatprep.subr.mxu0 %v3604_v1  ;;  %3416 = vmatprep.subr.mxu1 %v3604_v1 }
  0x3c   : > { %724 = vmatpush1.msra.mxu0 %v652_v15  ;;  %3440 = vmatpush1.msra.mxu1 %v652_v15 }
  0x3d   : > { %725 = vmatprep.subr.mxu0 %v3604_v1  ;;  %3417 = vmatprep.subr.mxu1 %v3604_v1 }
  0x3e   : > { %726 = vmatpush1.msra.mxu0 %v651_v16  ;;  %3441 = vmatpush1.msra.mxu1 %v651_v16 }
  0x3f   : > { %743 = vmatprep.subr.mxu0 %v3604_v1  ;;  %3418 = vmatprep.subr.mxu1 %v3604_v1 }
  0x40   : > { %744 = vmatpush2.msra.mxu0 %v674_v17  ;;  %3442 = vmatpush2.msra.mxu1 %v674_v17 }
  0x41   : > { %745 = vmatprep.subr.mxu0 %v3604_v1  ;;  %3419 = vmatprep.subr.mxu1 %v3604_v1 }
  0x42   : > { %746 = vmatpush2.msra.mxu0 %v673_v18  ;;  %3443 = vmatpush2.msra.mxu1 %v673_v18 }
  0x43   : > { %747 = vmatprep.subr.mxu0 %v3604_v1  ;;  %3420 = vmatprep.subr.mxu1 %v3604_v1 }
  0x44   : > { %748 = vmatpush2.msra.mxu0 %v672_v19  ;;  %3444 = vmatpush2.msra.mxu1 %v672_v19 }
  0x45   : > { %749 = vmatprep.subr.mxu0 %v3604_v1  ;;  %3421 = vmatprep.subr.mxu1 %v3604_v1 }
  0x46   : > { %750 = vmatpush2.msra.mxu0 %v671_v20  ;;  %3445 = vmatpush2.msra.mxu1 %v671_v20 }
  0x47   : > { %751 = vmatprep.subr.mxu0 %v3604_v1  ;;  %3422 = vmatprep.subr.mxu1 %v3604_v1 }
  0x48   : > { %752 = vmatpush2.msra.mxu0 %v670_v21  ;;  %3446 = vmatpush2.msra.mxu1 %v670_v21 }
  0x49   : > { %753 = vmatprep.subr.mxu0 %v3604_v1  ;;  %3423 = vmatprep.subr.mxu1 %v3604_v1 }
  0x4a   : > { %754 = vmatpush2.msra.mxu0 %v669_v22  ;;  %3447 = vmatpush2.msra.mxu1 %v669_v22 }
  0x4b   : > { %755 = vmatprep.subr.mxu0 %v3604_v1  ;;  %3424 = vmatprep.subr.mxu1 %v3604_v1 }
  0x4c   : > { %756 = vmatpush2.msra.mxu0 %v668_v23  ;;  %3448 = vmatpush2.msra.mxu1 %v668_v23 }
  0x4d   : > { %757 = vmatprep.subr.mxu0 %v3604_v1  ;;  %3425 = vmatprep.subr.mxu1 %v3604_v1 }
  0x4e   : > { %758 = vmatpush2.msra.mxu0 %v667_v24  ;;  %3449 = vmatpush2.msra.mxu1 %v667_v24 }
  0x4f   : > { %3010 = vmatprep.mubr.msk.f32.mxu0 %vm682_vm0, %v644_v25  ;;  %3012 = vmatprep.mubr.msk.f32.mxu1 %vm682_vm0, %v648_v26 }
  0x50   : > { %760 = vmatmul.mubr.f32.vlgmr.msra.gmra.mxu0 %v643_v27  ;;  %770 = vmatmul.mubr.f32.vlgmr.msra.gmra.mxu1 %v647_v28 }
  0x51   : > { %3011 = vmatprep.mubr.msk.f32.mxu0 %vm682_vm0, %v646_v29  ;;  %3013 = vmatprep.mubr.msk.f32.mxu1 %vm682_vm0, %v650_v30 }
  0x54   : > { %765 = vmatmul.mubr.f32.gmra.mxu0 %v645_v31  ;;  %775 = vmatmul.mubr.f32.gmra.mxu1 %v649_v32 }
 0x110   : > { %v761_v34 = vpop.f32.mrf.mxu0  ;;  %v771_v35 = vpop.f32.mrf.mxu1 }
 0x111   : > { %v762_v36 = vadd.f32 %v3009_v33, %v761_v34  ;;  %v772_v37 = vadd.f32 %v3009_v33, %v771_v35 }
 0x112   : > { %v763_v38 = vpop.f32.mrf.mxu0  ;;  %v773_v39 = vpop.f32.mrf.mxu1 }
 0x113   : > { %781 = vst.msk [vmem:[#allocation2] sm:$0xff] %vm780_vm1, %v762_v36  ;;  %783 = vst.msk [vmem:[#allocation2 + $0x10] sm:$0xff] %vm780_vm1, %v772_v37 }
 0x114   : > { %v766_v40 = vpop.f32.mrf.mxu0  ;;  %v776_v41 = vpop.f32.mrf.mxu1 }
 0x115   : > { %v767_v42 = vadd.f32 %v3009_v33, %v766_v40  ;;  %v777_v43 = vadd.f32 %v3009_v33, %v776_v41 }
 0x116   : > { %v768_v44 = vpop.f32.mrf.mxu0  ;;  %v778_v45 = vpop.f32.mrf.mxu1 }
 0x117   : > { %782 = vst.msk [vmem:[#allocation2 + $0x8] sm:$0xff] %vm780_vm1, %v767_v42  ;;  %784 = vst.msk [vmem:[#allocation2 + $0x18] sm:$0xff] %vm780_vm1, %v777_v43 }
 0x118 PF: > { %vm791_vm2 = vcmask 261120   ;;  %v872_v10 = vld [vmem:[%s3726_s21 + $0x38] sm:$0xff]  ;;  %v871_v11 = vld [vmem:[%s3726_s21 + $0x30] sm:$0xff]  ;;  %v870_v12 = vld [vmem:[%s3726_s21 + $0x28] sm:$0xff]  ;;  %v3605_v14 = vmov 0.0   ;;  %s4352_s30 = scalar_lea.vmem %s4327_s4, %s3708_s20  ;;  %s4353_s27 = sld [smem:[#allocation8_spill]] }
 0x119   : > { %909 = vmatprep.subr.mxu0 %v872_v10  ;;  %v869_v13 = vld [vmem:[%s3726_s21 + $0x20] sm:$0xff]  ;;  %949 = vmatprep.mubr.f32.mxu0 %v3605_v14  ;;  %v868_v15 = vld [vmem:[%s3726_s21 + $0x18] sm:$0xff]  ;;  %v867_v16 = vld [vmem:[%s3726_s21 + $0x10] sm:$0xff]  ;;  %vm998_vm3 = vcmask 130048   ;;  %s3606_s17 = smov 64   ;;  %s3607_s18 = smov 48  }
 0x11a   : > { %v785_v46 = vld [vmem:[#allocation2] sm:$0xff]  ;;  %v787_v47 = vld [vmem:[#allocation2 + $0x10] sm:$0xff]  ;;  %910 = vmatpush1.msra.mxu0 %v871_v11  ;;  %v866_v17 = vld [vmem:[%s3726_s21 + $0x8] sm:$0xff]  ;;  %s3608_s22 = smov 112   ;;  %s3612_s3 = smov 80   ;;  %vm2724_vm4 = vcmask 523264  }
 0x11b   : > { %v792_v49 = vsel %vm791_vm2, %v785_v46, 0.0  ;;  %v798_v50 = vsel %vm791_vm2, %v787_v47, 0.0  ;;  %911 = vmatprep.subr.mxu0 %v870_v12  ;;  %v865_v18 = vld [vmem:[%s3726_s21] sm:$0xff]  ;;  %s4355_s21 = sld [smem:[#allocation7_spill]]  ;;  %p3097_p5 = scmp.ne.s32.totalorder %s3702_s19, 1 }
 0x11c   : > { %793 = vadd.xlane.f32.xlu0 %v792_v49  ;;  %799 = vadd.xlane.f32.xlu1 %v798_v50  ;;  %v3014_v32 = vld [vmem:[%s4352_s30] ss:$0 sm:$0xff]  ;;  %s4356_s25 = sld [smem:[#allocation11_spill]] }
 0x11d   : > { %912 = vmatpush1.msra.mxu0 %v869_v13 }
 0x11e   : > { %v786_v48 = vld [vmem:[#allocation2 + $0x8] sm:$0xff]  ;;  %v788_v51 = vld [vmem:[#allocation2 + $0x18] sm:$0xff]  ;;  %913 = vmatprep.subr.mxu0 %v868_v15  ;;  %s4354_s29 = scalar_lea.vmem %s4353_s27, %s3708_s20 }
 0x11f   : > { %v795_v52 = vsel %vm791_vm2, %v786_v48, 0.0  ;;  %v801_v53 = vsel %vm791_vm2, %v788_v51, 0.0  ;;  %914 = vmatpush1.msra.mxu0 %v867_v16  ;;  %v3015_v34 = vld [vmem:[%s4354_s29] ss:$0 sm:$0xff] }
 0x120   : > { %796 = vadd.xlane.f32.xlu0 %v795_v52  ;;  %802 = vadd.xlane.f32.xlu1 %v801_v53 }
 0x121   : > { %915 = vmatprep.subr.mxu0 %v866_v17  ;;  %v4020_v13 = vld [vmem:[%s4355_s21 + $0x18] sm:$0xff] }
 0x122   : > { %916 = vmatpush1.msra.mxu0 %v865_v18  ;;  %s4357_s30 = scalar_lea.vmem %s4356_s25, %s3708_s20 }
 0x1a5   : > { %v794_v54 = vpop.xlane.xlu0 %793  ;;  %v800_v55 = vpop.xlane.xlu1 %799 }
 0x1a6   : > { %v805_v56 = vmul.f32 0.03125, %v794_v54  ;;  %v807_v57 = vmul.f32 0.03125, %v800_v55 }
 0x1a8   : > { %v809_v58 = vsub.f32 %v785_v46, %v805_v56  ;;  %v811_v59 = vsub.f32 %v787_v47, %v807_v57 }
 0x1a9   : > { %v797_v60 = vpop.xlane.xlu0 %796  ;;  %v803_v61 = vpop.xlane.xlu1 %802 }
 0x1aa   : > { %v806_v62 = vmul.f32 0.03125, %v797_v60  ;;  %v808_v63 = vmul.f32 0.03125, %v803_v61  ;;  %v813_v0 = vmul.f32 %v809_v58, %v809_v58  ;;  %v815_v1 = vmul.f32 %v811_v59, %v811_v59 }
 0x1ac   : > { %v810_v2 = vsub.f32 %v786_v48, %v806_v62  ;;  %v812_v3 = vsub.f32 %v788_v51, %v808_v63  ;;  %v817_v4 = vsel %vm791_vm2, %v813_v0, 0.0  ;;  %v823_v5 = vsel %vm791_vm2, %v815_v1, 0.0 }
 0x1ad   : > { %818 = vadd.xlane.f32.xlu0 %v817_v4 }
 0x1ae   : > { %v814_v6 = vmul.f32 %v810_v2, %v810_v2  ;;  %v816_v7 = vmul.f32 %v812_v3, %v812_v3 }
 0x1b0   : > { %v820_v8 = vsel %vm791_vm2, %v814_v6, 0.0  ;;  %v826_v9 = vsel %vm791_vm2, %v816_v7, 0.0  ;;  %v4009_v6 = vld [vmem:[%s4355_s21 + $0x8] sm:$0xff] }
 0x1b1   : > { %824 = vadd.xlane.f32.xlu0 %v823_v5  ;;  %821 = vadd.xlane.f32.xlu1 %v820_v8 }
 0x1b5   : > { %827 = vadd.xlane.f32.xlu1 %v826_v9  ;;  %v4014_v9 = vld [vmem:[%s4355_s21] sm:$0xff] }
 0x236   : > { %v819_v19 = vpop.xlane.xlu0 %818 }
 0x237   : > { %v829_v20 = vmul.f32 0.03125, %v819_v19 }
 0x239   : > { %v833_v21 = vadd.f32 1e-05, %v829_v20 }
 0x23a   : > { %v822_v22 = vpop.xlane.xlu1 %821  ;;  %v825_v23 = vpop.xlane.xlu0 %824 }
 0x23b   : > { %3476 = vrsqrt.f32 %v833_v21  ;;  %v830_v24 = vmul.f32 0.03125, %v822_v22  ;;  %v831_v25 = vmul.f32 0.03125, %v825_v23  ;;  %v4029_v21 = vld [vmem:[%s4355_s21 + $0x10] sm:$0xff] }
 0x23d   : > { %v834_v26 = vadd.f32 1e-05, %v830_v24  ;;  %v835_v27 = vadd.f32 1e-05, %v831_v25 }
 0x23e   : > { %v828_v28 = vpop.xlane.xlu1 %827 }
 0x23f   : > { %3478 = vrsqrt.f32 %v834_v26  ;;  %v832_v29 = vmul.f32 0.03125, %v828_v28 }
 0x240   : > { %3480 = vrsqrt.f32 %v835_v27 }
 0x241   : > { %v836_v30 = vadd.f32 1e-05, %v832_v29 }
 0x243   : > { %3482 = vrsqrt.f32 %v836_v30 }
 0x248   : > { %v3477_v31 = vpop.eup %3476 }
 0x249   : > { %v841_v33 = vmul.f32 %v3477_v31, %v809_v58 }
 0x24b   : > { %v851_v35 = vmul.f32 %v3014_v32, %v841_v33 }
 0x24c   : > { %v3479_v36 = vpop.eup %3478 }
 0x24d   : > { %v3481_v37 = vpop.eup %3480  ;;  %v861_v38 = vadd.f32 %v3015_v34, %v851_v35  ;;  %v842_v39 = vmul.f32 %v3479_v36, %v810_v2 }
 0x24e   : > { %v843_v40 = vmul.f32 %v3481_v37, %v811_v59 }
 0x24f   : > { %3016 = vmatmul.mubr.msk.f32.vlgmr.msra.gmra.mxu0 %vm791_vm2, %v861_v38  ;;  %v852_v41 = vmul.f32 %v3014_v32, %v842_v39 }
 0x250   : > { %v3483_v42 = vpop.eup %3482  ;;  %955 = vmatprep.mubr.f32.mxu0 %v3605_v14  ;;  %v853_v44 = vmul.f32 %v3014_v32, %v843_v40 }
 0x251   : > { %v862_v43 = vadd.f32 %v3015_v34, %v852_v41  ;;  %v844_v45 = vmul.f32 %v3483_v42, %v812_v3 }
 0x252   : > { %v863_v46 = vadd.f32 %v3015_v34, %v853_v44 }
 0x253   : > { %3017 = vmatmul.mubr.msk.f32.gmra.mxu0 %vm791_vm2, %v862_v43  ;;  %v854_v47 = vmul.f32 %v3014_v32, %v844_v45 }
 0x254   : > { %961 = vmatprep.mubr.f32.mxu0 %v3605_v14 }
 0x255   : > { %v864_v48 = vadd.f32 %v3015_v34, %v854_v47 }
 0x257   : > { %3018 = vmatmul.mubr.msk.f32.gmra.mxu0 %vm791_vm2, %v863_v46 }
 0x258   : > { %967 = vmatprep.mubr.f32.mxu0 %v3605_v14 }
 0x25b   : > { %3019 = vmatmul.mubr.msk.f32.gmra.mxu0 %vm791_vm2, %v864_v48 }
 0x30f   : > { %v3938_v49 = vpop.f32.mrf.mxu0 }
 0x310   : > { %3222 = vmatprep.mubr.msk.f32.mxu1 %vm998_vm3, %v3938_v49 }
 0x311   : > { %v3942_v50 = vpop.f32.mrf.mxu0 }
 0x313   : > { %v3944_v51 = vpop.f32.mrf.mxu0 }
 0x315   : > { %v3946_v52 = vpop.f32.mrf.mxu0 }
 0x317   : > { %v3948_v53 = vpop.f32.mrf.mxu0 }
 0x318   : > { %994 = vrot.lane.b32.xlu1 %v3948_v53, %s3606_s17 }
 0x319   : > { %v3951_v54 = vpop.f32.mrf.mxu0 }
 0x31b   : > { %v3953_v55 = vpop.f32.mrf.mxu0 }
 0x31c   : > { %992 = vrot.lane.b32.xlu1 %v3944_v51, %s3606_s17  ;;  %996 = vrot.lane.b32.xlu0 %v3953_v55, %s3606_s17 }
 0x31d   : > { %v3957_v56 = vpop.f32.mrf.mxu0 }
 0x31e   : > { %3228 = vmatprep.subr.mxu0 %v3957_v56 }
 0x31f   : > { %3229 = vmatpush3.msra.mxu0 %v3957_v56 }
 0x320   : > { %990 = vrot.lane.b32.xlu1 %v3938_v49, %s3606_s17  ;;  %1263 = vrot.lane.b32.xlu0 %v3953_v55, %s3607_s18  ;;  %s3609_s17 = smov 32  }
 0x321   : > { %3230 = vmatprep.subr.mxu0 %v3951_v54 }
 0x322   : > { %3231 = vmatpush3.msra.mxu0 %v3951_v54 }
 0x323   : > { %3232 = vmatprep.subr.mxu0 %v3946_v52 }
 0x324   : > { %3233 = vmatpush3.msra.mxu0 %v3946_v52  ;;  %1261 = vrot.lane.b32.xlu1 %v3948_v53, %s3607_s18 }
 0x325   : > { %1259 = vrot.lane.b32.xlu0 %v3944_v51, %s3607_s18  ;;  %3234 = vmatprep.subr.mxu0 %v3942_v50 }
 0x326   : > { %3235 = vmatpush3.msra.mxu0 %v3942_v50 }
 0x328   : > { %1257 = vrot.lane.b32.xlu1 %v3938_v49, %s3607_s18  ;;  %s3610_s18 = smov 96  }
 0x329   : > { %1249 = vrot.lane.b32.xlu0 %v3938_v49, %s3608_s22 }
 0x32c   : > { %1251 = vrot.lane.b32.xlu1 %v3944_v51, %s3608_s22 }
 0x32d   : > { %1253 = vrot.lane.b32.xlu0 %v3948_v53, %s3608_s22 }
 0x330   : > { %1255 = vrot.lane.b32.xlu1 %v3953_v55, %s3608_s22 }
 0x38a   : > { %v995_v57 = vpop.permute.xlu1 %994 }
 0x38e   : > { %v997_v58 = vpop.permute.xlu0 %996  ;;  %v993_v59 = vpop.permute.xlu1 %992 }
 0x38f   : > { %3214 = vmatprep.subr.msk.mxu1 %vm998_vm3, %v997_v58 }
 0x390   : > { %3215 = vmatpush3.xpose.msk.msra.mxu1 %vm998_vm3, %v997_v58 }
 0x391   : > { %3216 = vmatprep.subr.msk.mxu1 %vm998_vm3, %v995_v57 }
 0x392   : > { %v1264_v60 = vpop.permute.xlu0 %1263  ;;  %v991_v61 = vpop.permute.xlu1 %990 }
 0x394   : > { %3217 = vmatpush3.xpose.msk.msra.mxu1 %vm998_vm3, %v995_v57 }
 0x395   : > { %3218 = vmatprep.subr.msk.mxu1 %vm998_vm3, %v993_v59 }
 0x396   : > { %v1262_v63 = vpop.permute.xlu1 %1261 }
 0x397   : > { %v1260_v62 = vpop.permute.xlu0 %1259 }
 0x398   : > { %3219 = vmatpush3.xpose.msk.msra.mxu1 %vm998_vm3, %v993_v59 }
 0x399   : > { %3220 = vmatprep.subr.msk.mxu1 %vm998_vm3, %v991_v61 }
 0x39a   : > { %v1258_v1 = vpop.permute.xlu1 %1257 }
 0x39b   : > { %v1250_v0 = vpop.permute.xlu0 %1249 }
 0x39c   : > { %3221 = vmatpush3.xpose.msk.msra.mxu1 %vm998_vm3, %v991_v61 }
 0x39d   : > { %3242 = vmatprep.subr.msk.mxu1 %vm998_vm3, %v1264_v60 }
 0x39e   : > { %v1252_v2 = vpop.permute.xlu1 %1251 }
 0x39f   : > { %3223 = vmatmul.mubr.msk.f32.vlgmr.msra.gmra.mxu1 %vm998_vm3, %v3944_v51  ;;  %v1254_v3 = vpop.permute.xlu0 %1253 }
 0x3a0   : > { %3225 = vmatprep.mubr.msk.f32.mxu1 %vm998_vm3, %v3948_v53  ;;  %3243 = vmatpush3.xpose.msk.msra.mxu1 %vm998_vm3, %v1264_v60 }
 0x3a1   : > { %3244 = vmatprep.subr.msk.mxu1 %vm998_vm3, %v1262_v63 }
 0x3a2   : > { %v1256_v4 = vpop.permute.xlu1 %1255 }
 0x3a3   : > { %3226 = vmatmul.mubr.msk.f32.gmra.mxu1 %vm998_vm3, %v3953_v55 }
 0x3a4   : > { %3245 = vmatpush3.xpose.msk.msra.mxu1 %vm998_vm3, %v1262_v63  ;;  %3250 = vmatprep.mubr.msk.f32.mxu1 %vm998_vm3, %v1250_v0 }
 0x3a5   : > { %3246 = vmatprep.subr.msk.mxu1 %vm998_vm3, %v1260_v62 }
 0x3a8   : > { %3247 = vmatpush3.xpose.msk.msra.mxu1 %vm998_vm3, %v1260_v62 }
 0x3a9   : > { %3248 = vmatprep.subr.msk.mxu1 %vm998_vm3, %v1258_v1 }
 0x3ac   : > { %3249 = vmatpush3.xpose.msk.msra.mxu1 %vm998_vm3, %v1258_v1 }
 0x3af   : > { %3251 = vmatmul.mubr.msk.f32.vlgmr.msra.gmra.mxu1 %vm998_vm3, %v1252_v2 }
 0x3b0   : > { %3253 = vmatprep.mubr.msk.f32.mxu1 %vm998_vm3, %v1254_v3 }
 0x3b3   : > { %3254 = vmatmul.mubr.msk.f32.gmra.mxu1 %vm998_vm3, %v1256_v4 }
 0x45f   : > { %v3224_v5 = vpop.f32.mrf.mxu1 }
 0x460   : > { %v1101_v7 = vmul.f32 0.25, %v3224_v5 }
 0x461   : > { %v1081_v8 = vpop.f32.mrf.mxu1 }
 0x462   : > { %v1100_v10 = vmul.f32 0.25, %v1081_v8  ;;  %v1105_v11 = vadd.f32 %v1101_v7, %v4009_v6 }
 0x463   : > { %v3227_v12 = vpop.f32.mrf.mxu1 }
 0x464   : > { %v1103_v14 = vmul.f32 0.25, %v3227_v12  ;;  %v1111_v15 = vsel %vm791_vm2, %v1105_v11, -inf  ;;  %v1104_v16 = vadd.f32 %v1100_v10, %v4014_v9 }
 0x465   : > { %1112 = vmax.xlane.f32.xlu1 %v1111_v15  ;;  %v1091_v17 = vpop.f32.mrf.mxu1 }
 0x466   : > { %v1102_v18 = vmul.f32 0.25, %v1091_v17  ;;  %v1108_v19 = vsel %vm791_vm2, %v1104_v16, -inf  ;;  %v1107_v20 = vadd.f32 %v1103_v14, %v4020_v13 }
 0x467   : > { %1109 = vmax.xlane.f32.xlu0 %v1108_v19 }
 0x468   : > { %v1117_v22 = vsel %vm791_vm2, %v1107_v20, -inf  ;;  %v1106_v23 = vadd.f32 %v1102_v18, %v4029_v21 }
 0x46a   : > { %v1114_v24 = vsel %vm791_vm2, %v1106_v23, -inf }
 0x46b   : > { %1118 = vmax.xlane.f32.xlu0 %v1117_v22 }
 0x46f   : > { %1115 = vmax.xlane.f32.xlu0 %v1114_v24  ;;  %v3252_v25 = vpop.f32.mrf.mxu1 }
 0x470   : > { %v1367_v26 = vmul.f32 0.25, %v3252_v25 }
 0x471   : > { %v1347_v27 = vpop.f32.mrf.mxu1 }
 0x472   : > { %v1366_v28 = vmul.f32 0.25, %v1347_v27  ;;  %v1371_v29 = vadd.f32 %v1367_v26, %v4009_v6 }
 0x473   : > { %v3255_v30 = vpop.f32.mrf.mxu1 }
 0x474   : > { %v1369_v31 = vmul.f32 0.25, %v3255_v30  ;;  %v1377_v32 = vsel %vm791_vm2, %v1371_v29, -inf  ;;  %v1370_v33 = vadd.f32 %v1366_v28, %v4014_v9 }
 0x475   : > { %1378 = vmax.xlane.f32.xlu1 %v1377_v32  ;;  %v1357_v34 = vpop.f32.mrf.mxu1 }
 0x476   : > { %v1368_v35 = vmul.f32 0.25, %v1357_v34  ;;  %v1374_v36 = vsel %vm791_vm2, %v1370_v33, -inf  ;;  %v1373_v37 = vadd.f32 %v1369_v31, %v4020_v13 }
 0x477   : > { %1375 = vmax.xlane.f32.xlu0 %v1374_v36 }
 0x478   : > { %v1383_v38 = vsel %vm791_vm2, %v1373_v37, -inf  ;;  %v1372_v39 = vadd.f32 %v1368_v35, %v4029_v21 }
 0x479   : > { %1384 = vmax.xlane.f32.xlu1 %v1383_v38 }
 0x47a   : > { %v1380_v40 = vsel %vm791_vm2, %v1372_v39, -inf }
 0x47b   : > { %1381 = vmax.xlane.f32.xlu0 %v1380_v40 }
 0x4ee   : > { %v1113_v41 = vpop.xlane.xlu1 %1112 }
 0x4ef   : > { %v1121_v42 = vsub.f32 %v1105_v11, %v1113_v41 }
 0x4f0   : > { %v1110_v43 = vpop.xlane.xlu0 %1109 }
 0x4f1   : > { %v1126_v44 = vmul.f32 1.442695, %v1121_v42  ;;  %v1120_v45 = vsub.f32 %v1104_v16, %v1110_v43 }
 0x4f3   : > { %3484 = vpow2.f32 %v1126_v44  ;;  %v1124_v46 = vmul.f32 1.442695, %v1120_v45 }
 0x4f4   : > { %v1119_v47 = vpop.xlane.xlu0 %1118 }
 0x4f5   : > { %3486 = vpow2.f32 %v1124_v46  ;;  %v1123_v48 = vsub.f32 %v1107_v20, %v1119_v47 }
 0x4f7   : > { %v1130_v57 = vmul.f32 1.442695, %v1123_v48  ;;  %v977_v48 = vld [vmem:[%s3731_s15 + $0x18] sm:$0xff] }
 0x4f8   : > { %v1116_v58 = vpop.xlane.xlu0 %1115 }
 0x4f9   : > { %3488 = vpow2.f32 %v1130_v57  ;;  %v1122_v59 = vsub.f32 %v1106_v23, %v1116_v58 }
 0x4fb   : > { %v1128_v60 = vmul.f32 1.442695, %v1122_v59  ;;  %v976_v59 = vld [vmem:[%s3731_s15 + $0x10] sm:$0xff] }
 0x4fd   : > { %3490 = vpow2.f32 %v1128_v60 }
 0x4fe   : > { %v1379_v61 = vpop.xlane.xlu1 %1378 }
 0x4ff   : > { %v1387_v62 = vsub.f32 %v1371_v29, %v1379_v61 }
 0x500   : > { %v4042_v63 = vpop.eup %3484  ;;  %v1376_v0 = vpop.xlane.xlu0 %1375 }
 0x501   : > { %v1392_v1 = vmul.f32 1.442695, %v1387_v62  ;;  %v1386_v2 = vsub.f32 %v1370_v33, %v1376_v0  ;;  %v1135_v3 = vsel %vm791_vm2, %v4042_v63, 0.0  ;;  %v975_v0 = vld [vmem:[%s3731_s15 + $0x8] sm:$0xff] }
 0x502   : > { %v4046_v4 = vpop.eup %3486  ;;  %1136 = vadd.xlane.f32.xlu1 %v1135_v3  ;;  %v1385_v5 = vpop.xlane.xlu1 %1384  ;;  %3280 = vmatprep.subr.mxu1 %v975_v0 }
 0x503   : > { %3492 = vpow2.f32 %v1392_v1  ;;  %v1390_v7 = vmul.f32 1.442695, %v1386_v2  ;;  %v1389_v8 = vsub.f32 %v1373_v37, %v1385_v5  ;;  %v1132_v10 = vsel %vm791_vm2, %v4046_v4, 0.0  ;;  %3281 = vmatpush3.msra.mxu1 %v975_v0  ;;  %v974_v1 = vld [vmem:[%s3731_s15] sm:$0xff] }
 0x504   : > { %1133 = vadd.xlane.f32.xlu0 %v1132_v10  ;;  %v1382_v11 = vpop.xlane.xlu0 %1381  ;;  %3282 = vmatprep.subr.mxu1 %v974_v1 }
 0x505   : > { %3494 = vpow2.f32 %v1390_v7  ;;  %v1396_v12 = vmul.f32 1.442695, %v1389_v8  ;;  %v1388_v14 = vsub.f32 %v1372_v39, %v1382_v11  ;;  %3283 = vmatpush3.msra.mxu1 %v974_v1 }
 0x506   : > { %v4050_v15 = vpop.eup %3488 }
 0x507   : > { %3496 = vpow2.f32 %v1396_v12  ;;  %v1394_v16 = vmul.f32 1.442695, %v1388_v14  ;;  %v1141_v17 = vsel %vm791_vm2, %v4050_v15, 0.0 }
 0x508   : > { %1142 = vadd.xlane.f32.xlu1 %v1141_v17 }
 0x509   : > { %3498 = vpow2.f32 %v1394_v16 }
 0x50a   : > { %v4054_v18 = vpop.eup %3490 }
 0x50b   : > { %v1138_v19 = vsel %vm791_vm2, %v4054_v18, 0.0 }
 0x50c   : > { %1139 = vadd.xlane.f32.xlu0 %v1138_v19 }
 0x510   : > { %v4058_v20 = vpop.eup %3492 }
 0x511   : > { %v1401_v22 = vsel %vm791_vm2, %v4058_v20, 0.0 }
 0x512   : > { %v4062_v23 = vpop.eup %3494  ;;  %1402 = vadd.xlane.f32.xlu1 %v1401_v22 }
 0x513   : > { %v1398_v24 = vsel %vm791_vm2, %v4062_v23, 0.0 }
 0x514   : > { %v4066_v25 = vpop.eup %3496  ;;  %1399 = vadd.xlane.f32.xlu0 %v1398_v24 }
 0x515   : > { %v1407_v26 = vsel %vm791_vm2, %v4066_v25, 0.0 }
 0x516   : > { %v4070_v27 = vpop.eup %3498  ;;  %1408 = vadd.xlane.f32.xlu1 %v1407_v26 }
 0x517   : > { %v1404_v28 = vsel %vm791_vm2, %v4070_v27, 0.0 }
 0x518   : > { %1405 = vadd.xlane.f32.xlu0 %v1404_v28 }
 0x527   : > { %1426 = vrot.lane.b32.xlu1 %v3951_v54, %s3608_s22 }
 0x52b   : > { %1424 = vrot.lane.b32.xlu1 %v3946_v52, %s3608_s22 }
 0x52e   : > { %1428 = vrot.lane.b32.xlu0 %v3957_v56, %s3608_s22 }
 0x52f   : > { %1422 = vrot.lane.b32.xlu1 %v3942_v50, %s3608_s22  ;;  %s3611_s22 = smov 16  }
 0x532   : > { %1739 = vrot.lane.b32.xlu0 %v3953_v55, %s3609_s17 }
 0x533   : > { %1737 = vrot.lane.b32.xlu1 %v3948_v53, %s3609_s17 }
 0x536   : > { %1735 = vrot.lane.b32.xlu0 %v3944_v51, %s3609_s17 }
 0x537   : > { %1733 = vrot.lane.b32.xlu1 %v3938_v49, %s3609_s17 }
 0x53a   : > { %1725 = vrot.lane.b32.xlu0 %v3938_v49, %s3610_s18 }
 0x53b   : > { %1727 = vrot.lane.b32.xlu1 %v3944_v51, %s3610_s18 }
 0x53e   : > { %1729 = vrot.lane.b32.xlu0 %v3948_v53, %s3610_s18 }
 0x53f   : > { %1731 = vrot.lane.b32.xlu1 %v3953_v55, %s3610_s18 }
 0x542   : > { %2118 = vrot.lane.b32.xlu0 %v3953_v55, %s3611_s22 }
 0x543   : > { %2116 = vrot.lane.b32.xlu1 %v3948_v53, %s3611_s22 }
 0x546   : > { %2114 = vrot.lane.b32.xlu0 %v3944_v51, %s3611_s22 }
 0x547   : > { %2112 = vrot.lane.b32.xlu1 %v3938_v49, %s3611_s22 }
 0x54a   : > { %2104 = vrot.lane.b32.xlu0 %v3938_v49, %s3612_s3 }
 0x54b   : > { %2106 = vrot.lane.b32.xlu1 %v3944_v51, %s3612_s3 }
 0x54e   : > { %2108 = vrot.lane.b32.xlu0 %v3948_v53, %s3612_s3 }
 0x54f   : > { %2110 = vrot.lane.b32.xlu1 %v3953_v55, %s3612_s3 }
 0x58b   : > { %v1137_v29 = vpop.xlane.xlu1 %1136 }
 0x58c   : > { %3500 = vrcp.f32 %v1137_v29 }
 0x58d   : > { %v1134_v30 = vpop.xlane.xlu0 %1133 }
 0x58e   : > { %3502 = vrcp.f32 %v1134_v30 }
 0x591   : > { %v1143_v31 = vpop.xlane.xlu1 %1142 }
 0x592   : > { %3504 = vrcp.f32 %v1143_v31 }
 0x595   : > { %v1140_v32 = vpop.xlane.xlu0 %1139 }
 0x596   : > { %3506 = vrcp.f32 %v1140_v32 }
 0x599   : > { %v3501_v33 = vpop.eup %3500 }
 0x59a   : > { %v1149_v51 = vmul.f32 %v3501_v33, %v4042_v63 }
 0x59b   : > { %v3503_v34 = vpop.eup %3502  ;;  %v1403_v49 = vpop.xlane.xlu1 %1402 }
 0x59c   : > { %v1148_v35 = vmul.f32 %v3503_v34, %v4046_v4  ;;  %3508 = vrcp.f32 %v1403_v49 }
 0x59d   : > { %v1400_v53 = vpop.xlane.xlu0 %1399 }
 0x59e   : > { %3510 = vrcp.f32 %v1400_v53  ;;  %3236 = vmatprep.mubr.msk.f32.mxu0 %vm791_vm2, %v1148_v35 }
 0x59f   : > { %v1409_v55 = vpop.xlane.xlu1 %1408  ;;  %3237 = vmatmul.mubr.msk.f32.vlgmr.msra.gmra.mxu0 %vm791_vm2, %v1149_v51  ;;  %v3505_v37 = vpop.eup %3504 }
 0x5a0   : > { %3512 = vrcp.f32 %v1409_v55  ;;  %v1151_v42 = vmul.f32 %v3505_v37, %v4050_v15 }
 0x5a1   : > { %v1406_v36 = vpop.xlane.xlu0 %1405 }
 0x5a2   : > { %3514 = vrcp.f32 %v1406_v36 }
 0x5a3   : > { %v3507_v38 = vpop.eup %3506  ;;  %v1427_v39 = vpop.permute.xlu1 %1426 }
 0x5a4   : > { %v1150_v40 = vmul.f32 %v3507_v38, %v4054_v18 }
 0x5a5   : > { %v1429_v41 = vpop.permute.xlu0 %1428 }
 0x5a6   : > { %3239 = vmatprep.mubr.msk.f32.mxu0 %vm791_vm2, %v1150_v40  ;;  %3256 = vmatprep.subr.mxu0 %v1429_v41 }
 0x5a7   : > { %v1425_v43 = vpop.permute.xlu1 %1424  ;;  %3240 = vmatmul.mubr.msk.f32.gmra.mxu0 %vm791_vm2, %v1151_v42 }
 0x5a8   : > { %3257 = vmatpush3.msra.mxu0 %v1429_v41 }
 0x5a9   : > { %3258 = vmatprep.subr.mxu0 %v1427_v39  ;;  %v3509_v44 = vpop.eup %3508  ;;  %v1740_v63 = vpop.permute.xlu0 %1739 }
 0x5aa   : > { %3259 = vmatpush3.msra.mxu0 %v1427_v39  ;;  %v1415_v57 = vmul.f32 %v3509_v44, %v4058_v20 }
 0x5ab   : > { %v3511_v45 = vpop.eup %3510  ;;  %3260 = vmatprep.subr.mxu0 %v1425_v43  ;;  %v1423_v46 = vpop.permute.xlu1 %1422 }
 0x5ac   : > { %3261 = vmatpush3.msra.mxu0 %v1425_v43  ;;  %v1414_v47 = vmul.f32 %v3511_v45, %v4062_v23 }
 0x5ad   : > { %3262 = vmatprep.subr.mxu0 %v1423_v46  ;;  %v3513_v58 = vpop.eup %3512  ;;  %v1736_v5 = vpop.permute.xlu0 %1735 }
 0x5ae   : > { %3263 = vmatpush3.msra.mxu0 %v1423_v46  ;;  %3264 = vmatprep.mubr.msk.f32.mxu0 %vm791_vm2, %v1414_v47  ;;  %v1417_v62 = vmul.f32 %v3513_v58, %v4066_v25 }
 0x5af   : > { %v3515_v60 = vpop.eup %3514  ;;  %3270 = vmatprep.subr.mxu0 %v977_v48  ;;  %3265 = vmatmul.mubr.msk.f32.vlgmr.msra.gmra.mxu0 %vm791_vm2, %v1415_v57  ;;  %v1738_v8 = vpop.permute.xlu1 %1737 }
 0x5b0   : > { %3271 = vmatpush3.msra.mxu0 %v977_v48  ;;  %v1416_v61 = vmul.f32 %v3515_v60, %v4070_v27 }
 0x5b1   : > { %3272 = vmatprep.subr.mxu0 %v976_v59  ;;  %v1726_v10 = vpop.permute.xlu0 %1725 }
 0x5b2   : > { %3273 = vmatpush3.msra.mxu0 %v976_v59  ;;  %3267 = vmatprep.mubr.msk.f32.mxu0 %vm791_vm2, %v1416_v61 }
 0x5b3   : > { %3290 = vmatprep.subr.msk.mxu0 %vm998_vm3, %v1740_v63  ;;  %3268 = vmatmul.mubr.msk.f32.gmra.mxu0 %vm791_vm2, %v1417_v62  ;;  %v1734_v14 = vpop.permute.xlu1 %1733 }
 0x5b5   : > { %v1730_v16 = vpop.permute.xlu0 %1729 }
 0x5b7   : > { %v1728_v18 = vpop.permute.xlu1 %1727 }
 0x5b9   : > { %v2119_v19 = vpop.permute.xlu0 %2118 }
 0x5bb   : > { %v1732_v20 = vpop.permute.xlu1 %1731 }
 0x5bd   : > { %v2115_v22 = vpop.permute.xlu0 %2114 }
 0x5bf   : > { %v2117_v23 = vpop.permute.xlu1 %2116 }
 0x5c1   : > { %v2105_v24 = vpop.permute.xlu0 %2104 }
 0x5c3   : > { %v2113_v25 = vpop.permute.xlu1 %2112 }
 0x5c5   : > { %v2109_v27 = vpop.permute.xlu0 %2108 }
 0x5c7   : > { %v2107_v26 = vpop.permute.xlu1 %2106 }
 0x5cb   : > { %v2111_v28 = vpop.permute.xlu1 %2110 }
 0x65f   : > { %v3238_v2 = vpop.f32.mrf.mxu0 }
 0x661   : > { %v1230_v3 = vpop.f32.mrf.mxu0 }
 0x662   : > { %3284 = vmatprep.mubr.msk.f32.mxu1 %vm998_vm3, %v1230_v3 }
 0x663   : > { %3285 = vmatmul.mubr.msk.f32.vlgmr.msra.gmra.mxu1 %vm998_vm3, %v3238_v2 }
 0x667   : > { %v3241_v4 = vpop.f32.mrf.mxu0 }
 0x669   : > { %v1240_v7 = vpop.f32.mrf.mxu0 }
 0x66a   : > { %3287 = vmatprep.mubr.msk.f32.mxu1 %vm998_vm3, %v1240_v7 }
 0x66b   : > { %3288 = vmatmul.mubr.msk.f32.gmra.mxu1 %vm998_vm3, %v3241_v4 }
 0x66f   : > { %v3266_v11 = vpop.f32.mrf.mxu0 }
 0x671   : > { %v1512_v12 = vpop.f32.mrf.mxu0 }
 0x672   : > { %3274 = vmatprep.mubr.msk.f32.mxu0 %vm998_vm3, %v1512_v12 }
 0x673   : > { %v3269_v15 = vpop.f32.mrf.mxu0  ;;  %3275 = vmatmul.mubr.msk.f32.vlgmr.msra.gmra.mxu0 %vm998_vm3, %v3266_v11 }
 0x674   : > { %3291 = vmatpush3.xpose.msk.msra.mxu0 %vm998_vm3, %v1740_v63 }
 0x675   : > { %3292 = vmatprep.subr.msk.mxu0 %vm998_vm3, %v1738_v8  ;;  %v1522_v17 = vpop.f32.mrf.mxu0 }
 0x676   : > { %3277 = vmatprep.mubr.msk.f32.mxu0 %vm998_vm3, %v1522_v17 }
 0x677   : > { %3278 = vmatmul.mubr.msk.f32.gmra.mxu0 %vm998_vm3, %v3269_v15 }
 0x678   : > { %3293 = vmatpush3.xpose.msk.msra.mxu0 %vm998_vm3, %v1738_v8  ;;  %3298 = vmatprep.mubr.msk.f32.mxu0 %vm998_vm3, %v1726_v10 }
 0x679   : > { %3294 = vmatprep.subr.msk.mxu0 %vm998_vm3, %v1736_v5 }
 0x67c   : > { %3295 = vmatpush3.xpose.msk.msra.mxu0 %vm998_vm3, %v1736_v5 }
 0x67d   : > { %3296 = vmatprep.subr.msk.mxu0 %vm998_vm3, %v1734_v14 }
 0x680   : > { %3297 = vmatpush3.xpose.msk.msra.mxu0 %vm998_vm3, %v1734_v14 }
 0x681   : > { %3328 = vmatprep.subr.msk.mxu0 %vm998_vm3, %v2119_v19 }
 0x683   : > { %3299 = vmatmul.mubr.msk.f32.vlgmr.msra.gmra.mxu0 %vm998_vm3, %v1728_v18 }
 0x684   : > { %3301 = vmatprep.mubr.msk.f32.mxu0 %vm998_vm3, %v1730_v16  ;;  %3329 = vmatpush3.xpose.msk.msra.mxu0 %vm998_vm3, %v2119_v19 }
 0x685   : > { %3330 = vmatprep.subr.msk.mxu0 %vm998_vm3, %v2117_v23 }
 0x687   : > { %3302 = vmatmul.mubr.msk.f32.gmra.mxu0 %vm998_vm3, %v1732_v20 }
 0x688   : > { %3331 = vmatpush3.xpose.msk.msra.mxu0 %vm998_vm3, %v2117_v23  ;;  %3336 = vmatprep.mubr.msk.f32.mxu0 %vm998_vm3, %v2105_v24 }
 0x689   : > { %3332 = vmatprep.subr.msk.mxu0 %vm998_vm3, %v2115_v22 }
 0x68c   : > { %3333 = vmatpush3.xpose.msk.msra.mxu0 %vm998_vm3, %v2115_v22 }
 0x68d   : > { %3334 = vmatprep.subr.msk.mxu0 %vm998_vm3, %v2113_v25 }
 0x690   : > { %3335 = vmatpush3.xpose.msk.msra.mxu0 %vm998_vm3, %v2113_v25 }
 0x693   : > { %3337 = vmatmul.mubr.msk.f32.vlgmr.msra.gmra.mxu0 %vm998_vm3, %v2107_v26 }
 0x694   : > { %3339 = vmatprep.mubr.msk.f32.mxu0 %vm998_vm3, %v2109_v27 }
 0x697   : > { %3340 = vmatmul.mubr.msk.f32.gmra.mxu0 %vm998_vm3, %v2111_v28 }
 0x723   : > { %v3286_v29 = vpop.f32.mrf.mxu1 }
 0x725   : > { %v1706_v32 = vpop.f32.mrf.mxu1 }
 0x72b   : > { %v3289_v49 = vpop.f32.mrf.mxu1 }
 0x733   : > { %v3276_v30 = vpop.f32.mrf.mxu0 }
 0x734   : > { %v4158_v31 = vadd.f32 %v3286_v29, %v3276_v30 }
 0x735   : > { %v1609_v33 = vpop.f32.mrf.mxu0 }
 0x736   : > { %v4160_v34 = vadd.f32 %v1706_v32, %v1609_v33 }
 0x737   : > { %v3279_v35 = vpop.f32.mrf.mxu0 }
 0x738   : > { %v4162_v51 = vadd.f32 %v3289_v49, %v3279_v35 }
 0x739   : > { %v4164_v53 = vpop.f32.mrf.mxu0 }
 0x743   : > { %v3300_v55 = vpop.f32.mrf.mxu0 }
 0x744   : > { %v1843_v36 = vmul.f32 0.25, %v3300_v55 }
 0x745   : > { %v1823_v37 = vpop.f32.mrf.mxu0 }
 0x746   : > { %v1842_v38 = vmul.f32 0.25, %v1823_v37  ;;  %v1847_v39 = vadd.f32 %v1843_v36, %v4009_v6 }
 0x747   : > { %v3303_v40 = vpop.f32.mrf.mxu0 }
 0x748   : > { %v1853_v41 = vsel %vm791_vm2, %v1847_v39, -inf  ;;  %v1846_v42 = vadd.f32 %v1842_v38, %v4014_v9  ;;  %v1845_v44 = vmul.f32 0.25, %v3303_v40 }
 0x749   : > { %1854 = vmax.xlane.f32.xlu1 %v1853_v41  ;;  %v1833_v43 = vpop.f32.mrf.mxu0 }
 0x74a   : > { %v1844_v45 = vmul.f32 0.25, %v1833_v43  ;;  %v1850_v46 = vsel %vm791_vm2, %v1846_v42, -inf  ;;  %v1849_v57 = vadd.f32 %v1845_v44, %v4020_v13 }
 0x74b   : > { %1851 = vmax.xlane.f32.xlu0 %v1850_v46 }
 0x74c   : > { %v1848_v47 = vadd.f32 %v1844_v45, %v4029_v21  ;;  %v1859_v58 = vsel %vm791_vm2, %v1849_v57, -inf }
 0x74e   : > { %v1856_v48 = vsel %vm791_vm2, %v1848_v47, -inf }
 0x74f   : > { %1857 = vmax.xlane.f32.xlu0 %v1856_v48 }
 0x753   : > { %1860 = vmax.xlane.f32.xlu0 %v1859_v58  ;;  %v3338_v18 = vpop.f32.mrf.mxu0 }
 0x754   : > { %v2222_v29 = vmul.f32 0.25, %v3338_v18 }
 0x755   : > { %v2202_v19 = vpop.f32.mrf.mxu0 }
 0x756   : > { %v2221_v22 = vmul.f32 0.25, %v2202_v19  ;;  %v2226_v49 = vadd.f32 %v2222_v29, %v4009_v6 }
 0x757   : > { %v3341_v20 = vpop.f32.mrf.mxu0 }
 0x758   : > { %v2225_v25 = vadd.f32 %v2221_v22, %v4014_v9  ;;  %v2224_v26 = vmul.f32 0.25, %v3341_v20  ;;  %v2232_v35 = vsel %vm791_vm2, %v2226_v49, -inf }
 0x759   : > { %v2212_v23 = vpop.f32.mrf.mxu0 }
 0x75a   : > { %v2223_v24 = vmul.f32 0.25, %v2212_v23  ;;  %v2229_v27 = vsel %vm791_vm2, %v2225_v25, -inf  ;;  %v2228_v32 = vadd.f32 %v2224_v26, %v4020_v13 }
 0x75c   : > { %v2227_v28 = vadd.f32 %v2223_v24, %v4029_v21  ;;  %v2238_v33 = vsel %vm791_vm2, %v2228_v32, -inf }
 0x75e   : > { %v2235_v30 = vsel %vm791_vm2, %v2227_v28, -inf }
 0x7d2   : > { %v1855_v59 = vpop.xlane.xlu1 %1854 }
 0x7d3   : > { %v1863_v60 = vsub.f32 %v1847_v39, %v1855_v59 }
 0x7d4   : > { %v1852_v61 = vpop.xlane.xlu0 %1851 }
 0x7d5   : > { %v1868_v62 = vmul.f32 1.442695, %v1863_v60  ;;  %v1862_v63 = vsub.f32 %v1846_v42, %v1852_v61 }
 0x7d7   : > { %3516 = vpow2.f32 %v1868_v62  ;;  %v1866_v0 = vmul.f32 1.442695, %v1862_v63 }
 0x7d8   : > { %v1858_v1 = vpop.xlane.xlu0 %1857 }
 0x7d9   : > { %3518 = vpow2.f32 %v1866_v0  ;;  %v1864_v2 = vsub.f32 %v1848_v47, %v1858_v1 }
 0x7db   : > { %v1870_v3 = vmul.f32 1.442695, %v1864_v2 }
 0x7dc   : > { %v1861_v4 = vpop.xlane.xlu0 %1860 }
 0x7dd   : > { %3520 = vpow2.f32 %v1870_v3  ;;  %v1865_v5 = vsub.f32 %v1849_v57, %v1861_v4 }
 0x7df   : > { %v1872_v7 = vmul.f32 1.442695, %v1865_v5 }
 0x7e1   : > { %3522 = vpow2.f32 %v1872_v7 }
 0x7e4   : > { %v3517_v8 = vpop.eup %3516 }
 0x7e5   : > { %v1877_v10 = vsel %vm791_vm2, %v3517_v8, 0.0 }
 0x7e6   : > { %v3519_v11 = vpop.eup %3518  ;;  %1878 = vadd.xlane.f32.xlu1 %v1877_v10 }
 0x7e7   : > { %v1874_v12 = vsel %vm791_vm2, %v3519_v11, 0.0 }
 0x7e8   : > { %1875 = vadd.xlane.f32.xlu0 %v1874_v12  ;;  %v978_v12 = vld [vmem:[%s3731_s15 + $0x20] sm:$0xff] }
 0x7ea   : > { %v3521_v14 = vpop.eup %3520 }
 0x7eb   : > { %v1880_v15 = vsel %vm791_vm2, %v3521_v14, 0.0 }
 0x7ec   : > { %1881 = vadd.xlane.f32.xlu0 %v1880_v15 }
 0x7ee   : > { %v3523_v16 = vpop.eup %3522 }
 0x7ef   : > { %v1883_v17 = vsel %vm791_vm2, %v3523_v16, 0.0 }
 0x7f0   : > { %1884 = vadd.xlane.f32.xlu1 %v1883_v17 }
 0x801   : > { %1898 = vrot.lane.b32.xlu1 %v3951_v54, %s3610_s18 }
 0x802   : > { %1900 = vrot.lane.b32.xlu0 %v3957_v56, %s3610_s18 }
 0x805   : > { %1896 = vrot.lane.b32.xlu1 %v3946_v52, %s3610_s18 }
 0x809   : > { %1894 = vrot.lane.b32.xlu1 %v3942_v50, %s3610_s18 }
 0x821   : > { %2230 = vmax.xlane.f32.xlu0 %v2229_v27 }
 0x825   : > { %2236 = vmax.xlane.f32.xlu0 %v2235_v30 }
 0x829   : > { %2239 = vmax.xlane.f32.xlu0 %v2238_v33 }
 0x82d   : > { %2233 = vmax.xlane.f32.xlu1 %v2232_v35  ;;  %v981_v35 = vld [vmem:[%s3731_s15 + $0x38] sm:$0xff] }
 0x86f   : > { %v1879_v55 = vpop.xlane.xlu1 %1878 }
 0x871   : > { %v1876_v9 = vpop.xlane.xlu0 %1875 }
 0x872   : > { %3524 = vrcp.f32 %v1876_v9  ;;  %v980_v9 = vld [vmem:[%s3731_s15 + $0x30] sm:$0xff] }
 0x873   : > { %3526 = vrcp.f32 %v1879_v55 }
 0x875   : > { %v1882_v36 = vpop.xlane.xlu0 %1881 }
 0x876   : > { %3528 = vrcp.f32 %v1882_v36 }
 0x879   : > { %v1885_v21 = vpop.xlane.xlu1 %1884  ;;  %v1901_v37 = vpop.permute.xlu0 %1900 }
 0x87a   : > { %3530 = vrcp.f32 %v1885_v21  ;;  %3304 = vmatprep.subr.mxu1 %v1901_v37 }
 0x87b   : > { %3305 = vmatpush3.msra.mxu1 %v1901_v37 }
 0x87d   : > { %v1899_v13 = vpop.permute.xlu1 %1898 }
 0x87e   : > { %3306 = vmatprep.subr.mxu1 %v1899_v13 }
 0x87f   : > { %v3525_v38 = vpop.eup %3524  ;;  %3307 = vmatpush3.msra.mxu1 %v1899_v13 }
 0x880   : > { %v1890_v6 = vmul.f32 %v3525_v38, %v3519_v11  ;;  %v3527_v40 = vpop.eup %3526 }
 0x881   : > { %v1897_v39 = vpop.permute.xlu1 %1896  ;;  %v1891_v43 = vmul.f32 %v3527_v40, %v3517_v8  ;;  %v979_v8 = vld [vmem:[%s3731_s15 + $0x28] sm:$0xff] }
 0x882   : > { %3308 = vmatprep.subr.mxu1 %v1897_v39  ;;  %3312 = vmatprep.mubr.msk.f32.mxu1 %vm791_vm2, %v1890_v6 }
 0x883   : > { %3309 = vmatpush3.msra.mxu1 %v1897_v39  ;;  %v3529_v41 = vpop.eup %3528 }
 0x884   : > { %v1892_v45 = vmul.f32 %v3529_v41, %v3521_v14 }
 0x885   : > { %v1895_v42 = vpop.permute.xlu1 %1894 }
 0x886   : > { %3310 = vmatprep.subr.mxu1 %v1895_v42 }
 0x887   : > { %v3531_v44 = vpop.eup %3530  ;;  %3311 = vmatpush3.msra.mxu1 %v1895_v42 }
 0x888   : > { %3313 = vmatmul.mubr.msk.f32.vlgmr.msra.gmra.mxu1 %vm791_vm2, %v1891_v43  ;;  %v1893_v46 = vmul.f32 %v3531_v44, %v3523_v16  ;;  %3318 = vmatprep.subr.mxu1 %v979_v8  ;;  %v1716_v16 = vpop.f32.mrf.mxu1 }
 0x889   : > { %3315 = vmatprep.mubr.msk.f32.mxu1 %vm791_vm2, %v1892_v45  ;;  %3319 = vmatpush3.msra.mxu1 %v979_v8  ;;  %v1717_v38 = vadd.f32 %v1716_v16, %v4164_v53  ;;  %v3564_v45 = vld [vmem:[#allocation2 + $0x8] sm:$0xff] }
 0x88a   : > { %3320 = vmatprep.subr.mxu1 %v978_v12 }
 0x88b   : > { %3321 = vmatpush3.msra.mxu1 %v978_v12 }
 0x88c   : > { %3316 = vmatmul.mubr.msk.f32.gmra.mxu1 %vm791_vm2, %v1893_v46 }
 0x8aa   : > { %v2231_v47 = vpop.xlane.xlu0 %2230 }
 0x8ab   : > { %v2241_v48 = vsub.f32 %v2225_v25, %v2231_v47 }
 0x8ad   : > { %v2245_v57 = vmul.f32 1.442695, %v2241_v48 }
 0x8ae   : > { %v2237_v58 = vpop.xlane.xlu0 %2236 }
 0x8af   : > { %3532 = vpow2.f32 %v2245_v57  ;;  %v2243_v59 = vsub.f32 %v2227_v28, %v2237_v58  ;;  %v3565_v58 = vld [vmem:[#allocation2] sm:$0xff] }
 0x8b1   : > { %v2249_v60 = vmul.f32 1.442695, %v2243_v59 }
 0x8b2   : > { %v2240_v61 = vpop.xlane.xlu0 %2239 }
 0x8b3   : > { %3534 = vpow2.f32 %v2249_v60  ;;  %v2244_v62 = vsub.f32 %v2228_v32, %v2240_v61 }
 0x8b5   : > { %v2251_v1 = vmul.f32 1.442695, %v2244_v62 }
 0x8b6   : > { %v2234_v63 = vpop.xlane.xlu1 %2233 }
 0x8b7   : > { %v2242_v0 = vsub.f32 %v2226_v49, %v2234_v63 }
 0x8b9   : > { %v2247_v2 = vmul.f32 1.442695, %v2242_v0 }
 0x8bb   : > { %3536 = vpow2.f32 %v2247_v2 }
 0x8bc   : > { %v3533_v3 = vpop.eup %3532  ;;  %3538 = vpow2.f32 %v2251_v1  ;;  %v3566_v1 = vld [vmem:[#allocation2 + $0x18] sm:$0xff] }
 0x8bd   : > { %v2253_v4 = vsel %vm791_vm2, %v3533_v3, 0.0 }
 0x8be   : > { %2254 = vadd.xlane.f32.xlu0 %v2253_v4 }
 0x8c0   : > { %v3535_v5 = vpop.eup %3534 }
 0x8c1   : > { %v2259_v7 = vsel %vm791_vm2, %v3535_v5, 0.0 }
 0x8c2   : > { %2260 = vadd.xlane.f32.xlu0 %v2259_v7 }
 0x8c8   : > { %v3537_v10 = vpop.eup %3536 }
 0x8c9   : > { %v2256_v11 = vsel %vm791_vm2, %v3537_v10, 0.0  ;;  %v3539_v14 = vpop.eup %3538 }
 0x8ca   : > { %2257 = vadd.xlane.f32.xlu1 %v2256_v11  ;;  %v2262_v15 = vsel %vm791_vm2, %v3539_v14, 0.0 }
 0x8ce   : > { %2263 = vadd.xlane.f32.xlu1 %v2262_v15 }
 0x8d8   : > { %2279 = vrot.lane.b32.xlu0 %v3957_v56, %s3612_s3 }
 0x8df   : > { %2277 = vrot.lane.b32.xlu1 %v3951_v54, %s3612_s3 }
 0x8e3   : > { %2275 = vrot.lane.b32.xlu1 %v3946_v52, %s3612_s3 }
 0x8e7   : > { %2273 = vrot.lane.b32.xlu1 %v3942_v50, %s3612_s3 }
 0x947   : > { %v2255_v17 = vpop.xlane.xlu0 %2254 }
 0x948   : > { %3540 = vrcp.f32 %v2255_v17  ;;  %v3314_v18 = vpop.f32.mrf.mxu1 }
 0x94a   : > { %v1984_v19 = vpop.f32.mrf.mxu1 }
 0x94b   : > { %3322 = vmatprep.mubr.msk.f32.mxu1 %vm998_vm3, %v1984_v19  ;;  %v2261_v20 = vpop.xlane.xlu0 %2260 }
 0x94c   : > { %v3317_v22 = vpop.f32.mrf.mxu1  ;;  %3323 = vmatmul.mubr.msk.f32.vlgmr.msra.gmra.mxu1 %vm998_vm3, %v3314_v18 }
 0x94e   : > { %v1994_v56 = vpop.f32.mrf.mxu1 }
 0x94f   : > { %3325 = vmatprep.mubr.msk.f32.mxu1 %vm998_vm3, %v1994_v56  ;;  %v2280_v54 = vpop.permute.xlu0 %2279 }
 0x950   : > { %3326 = vmatmul.mubr.msk.f32.gmra.mxu1 %vm998_vm3, %v3317_v22  ;;  %3342 = vmatprep.subr.mxu1 %v2280_v54 }
 0x951   : > { %3343 = vmatpush3.msra.mxu1 %v2280_v54 }
 0x953   : > { %v2258_v50 = vpop.xlane.xlu1 %2257 }
 0x954   : > { %3542 = vrcp.f32 %v2258_v50 }
 0x955   : > { %v3541_v52 = vpop.eup %3540  ;;  %3544 = vrcp.f32 %v2261_v20 }
 0x956   : > { %v2269_v23 = vmul.f32 %v3541_v52, %v3533_v3  ;;  %v3567_v3 = vld [vmem:[#allocation2 + $0x10] sm:$0xff] }
 0x957   : > { %v2264_v24 = vpop.xlane.xlu1 %2263 }
 0x958   : > { %3546 = vrcp.f32 %v2264_v24  ;;  %3350 = vmatprep.mubr.msk.f32.mxu1 %vm791_vm2, %v2269_v23 }
 0x95b   : > { %v2278_v25 = vpop.permute.xlu1 %2277 }
 0x95c   : > { %3344 = vmatprep.subr.mxu1 %v2278_v25 }
 0x95d   : > { %3345 = vmatpush3.msra.mxu1 %v2278_v25 }
 0x95f   : > { %v2276_v26 = vpop.permute.xlu1 %2275 }
 0x960   : > { %3346 = vmatprep.subr.mxu1 %v2276_v26 }
 0x961   : > { %v3543_v27 = vpop.eup %3542  ;;  %3347 = vmatpush3.msra.mxu1 %v2276_v26 }
 0x962   : > { %v3545_v28 = vpop.eup %3544  ;;  %v2270_v30 = vmul.f32 %v3543_v27, %v3537_v10 }
 0x963   : > { %v2274_v29 = vpop.permute.xlu1 %2273  ;;  %v2271_v33 = vmul.f32 %v3545_v28, %v3535_v5 }
 0x964   : > { %3348 = vmatprep.subr.mxu1 %v2274_v29 }
 0x965   : > { %v3547_v32 = vpop.eup %3546  ;;  %3349 = vmatpush3.msra.mxu1 %v2274_v29 }
 0x966   : > { %3351 = vmatmul.mubr.msk.f32.vlgmr.msra.gmra.mxu1 %vm791_vm2, %v2270_v30  ;;  %v2272_v49 = vmul.f32 %v3547_v32, %v3539_v14  ;;  %3356 = vmatprep.subr.mxu1 %v981_v35  ;;  %v2575_v30 = vld [vmem:[%s3749_s8 + $0x18] sm:$0xff]  ;;  %v2574_v32 = vld [vmem:[%s3749_s8 + $0x10] sm:$0xff] }
 0x967   : > { %3353 = vmatprep.mubr.msk.f32.mxu1 %vm791_vm2, %v2271_v33  ;;  %3357 = vmatpush3.msra.mxu1 %v981_v35  ;;  %v2573_v33 = vld [vmem:[%s3749_s8 + $0x8] sm:$0xff] }
 0x968   : > { %3358 = vmatprep.subr.mxu1 %v980_v9  ;;  %3366 = vmatprep.subr.mxu0 %v2575_v30 }
 0x969   : > { %3359 = vmatpush3.msra.mxu1 %v980_v9  ;;  %3367 = vmatpush3.msra.mxu0 %v2575_v30 }
 0x96a   : > { %3354 = vmatmul.mubr.msk.f32.gmra.mxu1 %vm791_vm2, %v2272_v49  ;;  %3368 = vmatprep.subr.mxu0 %v2574_v32  ;;  %v2572_v49 = vld [vmem:[%s3749_s8] sm:$0xff] }
 0x96b   : > { %3369 = vmatpush3.msra.mxu0 %v2574_v32 }
 0x96c   : > { %3370 = vmatprep.subr.mxu0 %v2573_v33 }
 0x96d   : > { %3371 = vmatpush3.msra.mxu0 %v2573_v33 }
 0x96e   : > { %3372 = vmatprep.subr.mxu0 %v2572_v49 }
 0x96f   : > { %3373 = vmatpush3.msra.mxu0 %v2572_v49 }
 0xa0c   : > { %v3324_v55 = vpop.f32.mrf.mxu1 }
 0xa0d   : > { %v2101_v36 = vadd.f32 %v3324_v55, %v4158_v31 }
 0xa0e   : > { %v2081_v21 = vpop.f32.mrf.mxu1 }
 0xa0f   : > { %v2100_v37 = vadd.f32 %v2081_v21, %v4160_v34 }
 0xa10   : > { %v3327_v13 = vpop.f32.mrf.mxu1 }
 0xa11   : > { %v2103_v6 = vadd.f32 %v3327_v13, %v4162_v51  ;;  %v3084_v51 = vld [vmem:[%s4357_s30] ss:$0 sm:$0xff] }
 0xa12   : > { %v2091_v39 = vpop.f32.mrf.mxu1 }
 0xa13   : > { %v2102_v40 = vadd.f32 %v2091_v39, %v1717_v38 }
 0xa26   : > { %v3352_v41 = vpop.f32.mrf.mxu1 }
 0xa28   : > { %v2363_v42 = vpop.f32.mrf.mxu1 }
 0xa29   : > { %3360 = vmatprep.mubr.msk.f32.mxu1 %vm998_vm3, %v2363_v42 }
 0xa2a   : > { %v3355_v43 = vpop.f32.mrf.mxu1  ;;  %3361 = vmatmul.mubr.msk.f32.vlgmr.msra.gmra.mxu1 %vm998_vm3, %v3352_v41 }
 0xa2c   : > { %v2373_v44 = vpop.f32.mrf.mxu1 }
 0xa2d   : > { %3363 = vmatprep.mubr.msk.f32.mxu1 %vm998_vm3, %v2373_v44  ;;  %v3085_v44 = vld [vmem:[%s619_s24] ss:$0 sm:$0xff] }
 0xa2e   : > { %3364 = vmatmul.mubr.msk.f32.gmra.mxu1 %vm998_vm3, %v3355_v43 }
 0xaea   : > { %v3362_v31 = vpop.f32.mrf.mxu1 }
 0xaeb   : > { %v2480_v34 = vadd.f32 %v3362_v31, %v2101_v36 }
 0xaec   : > { %v2460_v53 = vpop.f32.mrf.mxu1 }
 0xaed   : > { %v2484_v46 = vadd.f32 %v3564_v45, %v2480_v34  ;;  %v2479_v47 = vadd.f32 %v2460_v53, %v2100_v37  ;;  %v3086_v53 = vld [vmem:[%s622_s5] ss:$0 sm:$0xff] }
 0xaee   : > { %v3365_v48 = vpop.f32.mrf.mxu1 }
 0xaef   : > { %v4235_v57 = vadd.f32 %v3084_v51, %v2484_v46  ;;  %v2483_v59 = vadd.f32 %v3565_v58, %v2479_v47  ;;  %v2482_v60 = vadd.f32 %v3365_v48, %v2103_v6 }
 0xaf0   : > { %v2470_v61 = vpop.f32.mrf.mxu1 }
 0xaf1   : > { %v4237_v62 = vadd.f32 %v3084_v51, %v2483_v59  ;;  %v2481_v63 = vadd.f32 %v2470_v61, %v2102_v40  ;;  %v2503_v0 = vsel %vm791_vm2, %v4235_v57, 0.0  ;;  %v2486_v2 = vadd.f32 %v3566_v1, %v2482_v60 }
 0xaf2   : > { %2504 = vadd.xlane.f32.xlu1 %v2503_v0 }
 0xaf3   : > { %v2485_v4 = vadd.f32 %v3567_v3, %v2481_v63  ;;  %v2500_v5 = vsel %vm791_vm2, %v4237_v62, 0.0  ;;  %v4245_v8 = vadd.f32 %v3084_v51, %v2486_v2  ;;  %v2723_v2 = vld [vmem:[%s3754_s7 + $0x38] sm:$0xff]  ;;  %v2722_v3 = vld [vmem:[%s3754_s7 + $0x30] sm:$0xff] }
 0xaf4   : > { %2501 = vadd.xlane.f32.xlu0 %v2500_v5  ;;  %3380 = vmatprep.subr.mxu1 %v2723_v2  ;;  %v2720_v5 = vld [vmem:[%s3754_s7 + $0x20] sm:$0xff] }
 0xaf5   : > { %v4243_v7 = vadd.f32 %v3084_v51, %v2485_v4  ;;  %v2509_v11 = vsel %vm791_vm2, %v4245_v8, 0.0  ;;  %3381 = vmatpush3.msra.mxu1 %v2723_v2  ;;  %v2721_v4 = vld [vmem:[%s3754_s7 + $0x28] sm:$0xff] }
 0xaf6   : > { %3382 = vmatprep.subr.mxu1 %v2722_v3 }
 0xaf7   : > { %v2506_v10 = vsel %vm791_vm2, %v4243_v7, 0.0  ;;  %3383 = vmatpush3.msra.mxu1 %v2722_v3 }
 0xaf8   : > { %2507 = vadd.xlane.f32.xlu0 %v2506_v10  ;;  %3384 = vmatprep.subr.mxu1 %v2721_v4  ;;  %v2719_v10 = vld [vmem:[%s3754_s7 + $0x18] sm:$0xff] }
 0xaf9   : > { %3385 = vmatpush3.msra.mxu1 %v2721_v4 }
 0xafa   : > { %3386 = vmatprep.subr.mxu1 %v2720_v5 }
 0xafb   : > { %3387 = vmatpush3.msra.mxu1 %v2720_v5 }
 0xafc   : > { %2510 = vadd.xlane.f32.xlu0 %v2509_v11  ;;  %3388 = vmatprep.subr.mxu1 %v2719_v10  ;;  %v2718_v11 = vld [vmem:[%s3754_s7 + $0x10] sm:$0xff] }
 0xafd   : > { %3389 = vmatpush3.msra.mxu1 %v2719_v10 }
 0xafe   : > { %3390 = vmatprep.subr.mxu1 %v2718_v11 }
 0xaff   : > { %3391 = vmatpush3.msra.mxu1 %v2718_v11 }
 0xb7b   : > { %v2505_v12 = vpop.xlane.xlu1 %2504 }
 0xb7c   : > { %v2513_v14 = vmul.f32 0.03125, %v2505_v12  ;;  %v2717_v12 = vld [vmem:[%s3754_s7 + $0x8] sm:$0xff] }
 0xb7d   : > { %v2502_v15 = vpop.xlane.xlu0 %2501  ;;  %3392 = vmatprep.subr.mxu1 %v2717_v12 }
 0xb7e   : > { %v2517_v16 = vsub.f32 %v4235_v57, %v2513_v14  ;;  %v2512_v17 = vmul.f32 0.03125, %v2502_v15  ;;  %v2716_v14 = vld [vmem:[%s3754_s7] sm:$0xff]  ;;  %3393 = vmatpush3.msra.mxu1 %v2717_v12 }
 0xb7f   : > { %3394 = vmatprep.subr.mxu1 %v2716_v14  ;;  %v3087_v15 = vld [vmem:[%s630_s16] ss:$0 sm:$0xff] }
 0xb80   : > { %v2516_v18 = vsub.f32 %v4237_v62, %v2512_v17  ;;  %v2521_v19 = vmul.f32 %v2517_v16, %v2517_v16  ;;  %3395 = vmatpush3.msra.mxu1 %v2716_v14 }
 0xb81   : > { %v2508_v20 = vpop.xlane.xlu0 %2507 }
 0xb82   : > { %v2514_v22 = vmul.f32 0.03125, %v2508_v20  ;;  %v2527_v56 = vsel %vm791_vm2, %v2521_v19, 0.0  ;;  %v2520_v54 = vmul.f32 %v2516_v18, %v2516_v18 }
 0xb83   : > { %2528 = vadd.xlane.f32.xlu1 %v2527_v56 }
 0xb84   : > { %v2518_v50 = vsub.f32 %v4243_v7, %v2514_v22  ;;  %v2524_v52 = vsel %vm791_vm2, %v2520_v54, 0.0 }
 0xb85   : > { %2525 = vadd.xlane.f32.xlu0 %v2524_v52  ;;  %v2511_v23 = vpop.xlane.xlu0 %2510 }
 0xb86   : > { %v2515_v24 = vmul.f32 0.03125, %v2511_v23  ;;  %v2522_v25 = vmul.f32 %v2518_v50, %v2518_v50 }
 0xb88   : > { %v2519_v26 = vsub.f32 %v4245_v8, %v2515_v24  ;;  %v2530_v27 = vsel %vm791_vm2, %v2522_v25, 0.0 }
 0xb89   : > { %2531 = vadd.xlane.f32.xlu0 %v2530_v27 }
 0xb8a   : > { %v2523_v28 = vmul.f32 %v2519_v26, %v2519_v26 }
 0xb8c   : > { %v2533_v29 = vsel %vm791_vm2, %v2523_v28, 0.0 }
 0xb8d   : > { %2534 = vadd.xlane.f32.xlu1 %v2533_v29 }
 0xc0c   : > { %v2529_v35 = vpop.xlane.xlu1 %2528 }
 0xc0d   : > { %v2537_v9 = vmul.f32 0.03125, %v2529_v35 }
 0xc0e   : > { %v2526_v55 = vpop.xlane.xlu0 %2525 }
 0xc0f   : > { %v2541_v36 = vadd.f32 1e-05, %v2537_v9  ;;  %v2536_v21 = vmul.f32 0.03125, %v2526_v55 }
 0xc11   : > { %3548 = vrsqrt.f32 %v2541_v36  ;;  %v2540_v37 = vadd.f32 1e-05, %v2536_v21 }
 0xc12   : > { %v2532_v13 = vpop.xlane.xlu0 %2531 }
 0xc13   : > { %3550 = vrsqrt.f32 %v2540_v37  ;;  %v2538_v38 = vmul.f32 0.03125, %v2532_v13 }
 0xc15   : > { %v2542_v6 = vadd.f32 1e-05, %v2538_v38 }
 0xc16   : > { %v2535_v39 = vpop.xlane.xlu1 %2534 }
 0xc17   : > { %3552 = vrsqrt.f32 %v2542_v6  ;;  %v2539_v40 = vmul.f32 0.03125, %v2535_v39 }
 0xc19   : > { %v2543_v41 = vadd.f32 1e-05, %v2539_v40 }
 0xc1b   : > { %3554 = vrsqrt.f32 %v2543_v41 }
 0xc1e   : > { %v3549_v42 = vpop.eup %3548 }
 0xc1f   : > { %v2549_v43 = vmul.f32 %v3549_v42, %v2517_v16 }
 0xc20   : > { %v3551_v31 = vpop.eup %3550 }
 0xc21   : > { %v2548_v34 = vmul.f32 %v3551_v31, %v2516_v18  ;;  %v2559_v51 = vmul.f32 %v3085_v44, %v2549_v43 }
 0xc23   : > { %v2558_v45 = vmul.f32 %v3085_v44, %v2548_v34  ;;  %v2569_v58 = vadd.f32 %v3086_v53, %v2559_v51 }
 0xc24   : > { %v3553_v46 = vpop.eup %3552 }
 0xc25   : > { %v2568_v47 = vadd.f32 %v3086_v53, %v2558_v45  ;;  %v2550_v48 = vmul.f32 %v3553_v46, %v2518_v50 }
 0xc27   : > { %3374 = vmatprep.mubr.msk.f32.mxu0 %vm791_vm2, %v2568_v47  ;;  %v2560_v59 = vmul.f32 %v3085_v44, %v2550_v48 }
 0xc28   : > { %v3555_v60 = vpop.eup %3554  ;;  %3375 = vmatmul.mubr.msk.f32.vlgmr.msra.gmra.mxu0 %vm791_vm2, %v2569_v58 }
 0xc29   : > { %v2570_v61 = vadd.f32 %v3086_v53, %v2560_v59  ;;  %v2551_v63 = vmul.f32 %v3555_v60, %v2519_v26  ;;  %v3096_v59 = vld [vmem:[%s638_s26] ss:$0 sm:$0xff] }
 0xc2b   : > { %3377 = vmatprep.mubr.msk.f32.mxu0 %vm791_vm2, %v2570_v61  ;;  %v2561_v0 = vmul.f32 %v3085_v44, %v2551_v63 }
 0xc2d   : > { %v2571_v1 = vadd.f32 %v3086_v53, %v2561_v0 }
 0xc2f   : > { %3378 = vmatmul.mubr.msk.f32.gmra.mxu0 %vm791_vm2, %v2571_v1 }
 0xce8   : > { %v3376_v16 = vpop.f32.mrf.mxu0 }
 0xce9   : > { %v2667_v17 = vadd.f32 %v3376_v16, %v3087_v15 }
 0xcea   : > { %v2661_v18 = vpop.f32.mrf.mxu0 }
 0xceb   : > { %v2685_v19 = vmul.f32 0.044715, %v2667_v17  ;;  %v2662_v20 = vadd.f32 %v3087_v15, %v2661_v18  ;;  %v2681_v42 = vmul.f32 0.5, %v2667_v17 }
 0xced   : > { %v2689_v22 = vmul.f32 %v2685_v19, %v2667_v17  ;;  %v2684_v56 = vmul.f32 0.044715, %v2662_v20  ;;  %v2680_v40 = vmul.f32 0.5, %v2662_v20 }
 0xcef   : > { %v2693_v54 = vmul.f32 %v2689_v22, %v2667_v17  ;;  %v2688_v50 = vmul.f32 %v2684_v56, %v2662_v20  ;;  %v3379_v52 = vpop.f32.mrf.mxu0 }
 0xcf0   : > { %v2677_v23 = vadd.f32 %v3379_v52, %v3087_v15 }
 0xcf1   : > { %v2697_v24 = vadd.f32 %v2693_v54, %v2667_v17  ;;  %v2692_v25 = vmul.f32 %v2688_v50, %v2662_v20  ;;  %v2671_v26 = vpop.f32.mrf.mxu0 }
 0xcf2   : > { %v2687_v27 = vmul.f32 0.044715, %v2677_v23  ;;  %v2672_v28 = vadd.f32 %v3087_v15, %v2671_v26  ;;  %v2683_v46 = vmul.f32 0.5, %v2677_v23 }
 0xcf3   : > { %v2701_v29 = vmul.f32 0.7978846, %v2697_v24  ;;  %v2696_v30 = vadd.f32 %v2692_v25, %v2662_v20 }
 0xcf4   : > { %v2691_v32 = vmul.f32 %v2687_v27, %v2677_v23  ;;  %v2686_v33 = vmul.f32 0.044715, %v2672_v28  ;;  %v2682_v53 = vmul.f32 0.5, %v2672_v28 }
 0xcf5   : > { %3556 = vtanh.f32 %v2701_v29  ;;  %v2700_v49 = vmul.f32 0.7978846, %v2696_v30 }
 0xcf6   : > { %v2695_v35 = vmul.f32 %v2691_v32, %v2677_v23  ;;  %v2690_v9 = vmul.f32 %v2686_v33, %v2672_v28 }
 0xcf7   : > { %3558 = vtanh.f32 %v2700_v49 }
 0xcf8   : > { %v2699_v55 = vadd.f32 %v2695_v35, %v2677_v23  ;;  %v2694_v36 = vmul.f32 %v2690_v9, %v2672_v28 }
 0xcfa   : > { %v2698_v21 = vadd.f32 %v2694_v36, %v2672_v28  ;;  %v2703_v37 = vmul.f32 0.7978846, %v2699_v55 }
 0xcfc   : > { %v2702_v13 = vmul.f32 0.7978846, %v2698_v21  ;;  %3560 = vtanh.f32 %v2703_v37 }
 0xcfe   : > { %3562 = vtanh.f32 %v2702_v13 }
 0xd02   : > { %v3557_v38 = vpop.eup %3556 }
 0xd03   : > { %v2709_v39 = vadd.f32 1.0, %v3557_v38 }
 0xd04   : > { %v3559_v6 = vpop.eup %3558 }
 0xd05   : > { %v2708_v41 = vadd.f32 1.0, %v3559_v6  ;;  %v2713_v44 = vmul.f32 %v2709_v39, %v2681_v42 }
 0xd07   : > { %v2712_v43 = vmul.f32 %v2708_v41, %v2680_v40 }
 0xd09   : > { %v3561_v31 = vpop.eup %3560  ;;  %3396 = vmatprep.mubr.msk.f32.mxu1 %vm2724_vm4, %v2712_v43 }
 0xd0a   : > { %3397 = vmatmul.mubr.msk.f32.vlgmr.msra.gmra.mxu1 %vm2724_vm4, %v2713_v44  ;;  %v2711_v51 = vadd.f32 1.0, %v3561_v31 }
 0xd0b   : > { %v3563_v34 = vpop.eup %3562 }
 0xd0c   : > { %v2710_v45 = vadd.f32 1.0, %v3563_v34  ;;  %v2715_v48 = vmul.f32 %v2711_v51, %v2683_v46 }
 0xd0e   : > { %v2714_v47 = vmul.f32 %v2710_v45, %v2682_v53 }
 0xd10   : > { %3399 = vmatprep.mubr.msk.f32.mxu1 %vm2724_vm4, %v2714_v47 }
 0xd11   : > { %3400 = vmatmul.mubr.msk.f32.gmra.mxu1 %vm2724_vm4, %v2715_v48 }
 0xdca   : > { %v3398_v58 = vpop.f32.mrf.mxu1 }
 0xdcb   : > { %v2823_v60 = vadd.f32 %v3398_v58, %v4235_v57 }
 0xdcc   : > { %v2803_v61 = vpop.f32.mrf.mxu1 }
 0xdcd   : > { %v2834_v63 = vadd.f32 %v3096_v59, %v2823_v60  ;;  %v2822_v0 = vadd.f32 %v2803_v61, %v4237_v62 }
 0xdcf   : > { %2838 = vst.msk [vmem:[#allocation2 + $0x8] sm:$0xff] %vm791_vm2, %v2834_v63  ;;  %v2833_v1 = vadd.f32 %v3096_v59, %v2822_v0 }
 0xdd1   : > { %2837 = vst.msk [vmem:[#allocation2] sm:$0xff] %vm791_vm2, %v2833_v1  ;;  %v3401_v2 = vpop.f32.mrf.mxu1 }
 0xdd2   : > { %v2825_v3 = vadd.f32 %v3401_v2, %v4245_v8 }
 0xdd3   : > { %v2813_v4 = vpop.f32.mrf.mxu1 }
 0xdd4   : > { %v2836_v5 = vadd.f32 %v3096_v59, %v2825_v3  ;;  %v2824_v10 = vadd.f32 %v2813_v4, %v4243_v7  ;;  %2844 = sbr.rel (%p3097_p5) target bundleno = 3547 (0xddb), region = 88 }
 0xdd6   : > { %2840 = vst.msk [vmem:[#allocation2 + $0x18] sm:$0xff] %vm791_vm2, %v2836_v5  ;;  %v2835_v11 = vadd.f32 %v3096_v59, %v2824_v10 }
 0xdd8   : > { %2839 = vst.msk [vmem:[#allocation2 + $0x10] sm:$0xff] %vm791_vm2, %v2835_v11 }
 0xdd9   : > { %2845 = vst.msk [vmem:[#allocation3] sm:$0xff] %vm791_vm2, %v2833_v1  ;;  %2846 = vst.msk [vmem:[#allocation3 + $0x8] sm:$0xff] %vm791_vm2, %v2834_v63 }
 0xdda   : > { %2847 = vst.msk [vmem:[#allocation3 + $0x10] sm:$0xff] %vm791_vm2, %v2835_v11  ;;  %2848 = vst.msk [vmem:[#allocation3 + $0x18] sm:$0xff] %vm791_vm2, %v2836_v5 }
 0xddb PF: > { %p3454_p6 = scmp.eq.s32.totalorder %s3702_s19, 1  ;;  %s3613_s20 = smov [#allocation3]  }
 0xddc   : > { %s2855_s26 = sshll.u32 %s3613_s20, 4  ;;  %s2856_s26 = int_to_ptr.vmem [resolvable:$true] %s2855_s26 }
 0xddd   : > { %s3568_s29 = scalar_lea.vmem %s2856_s26, 512  ;;  %p3575_p10 = scmp.lt.s32.totalorder %s2856_s26, %s2856_s26 }
 0xdde   : > { %p3569_p7 = scmp.ne.s32.totalorder %s2856_s26, %s3568_s29  ;;  %p3576_p11 = scmp.lt.s32.totalorder %s3568_s29, %s3568_s29 }
 0xde0   : > { %p3570_p8 = pnand %p3569_p7, %p3454_p6  ;;  %p3577_p12 = por %p3576_p11, %p3575_p10 }
 0xde2   : > { %p3571_p9 = pneg %p3570_p8 }
 0xde4   : > { %p3578_p13 = pnand %p3577_p12, %p3571_p9 }
 0xde6   : > { %3581 = shalt.err (!%p3578_p13)
}
 0xde7   : > { %s3614_s17 = smov 128   ;;  %s3615_s18 = smov 8  }
 0xde8   : > { %s4358_s15 = sld [smem:[#allocation12_spill]] }
 0xdee   : > { %3451 = dma.vmem_to_hbm [thread:$0]  (%p3454_p6), %s2856_s26, 512, %s4358_s15, [#allocation4], %s3614_s17, %s3614_s17, %s3615_s18  }
 0xdef   : > { %3597 = dma.done.wait (%p3454_p6), [#allocation4], 512  }
 0xdf0   : > { %3599 = vsyncadd (%p3454_p6), [#allocation4], 4294966784 }
 0xdf1 PF: > { %s4359_s23 = sld [smem:[#allocation6_spill]] }
 0xdf7   : > { %s26_s18 = sadd.s32 1, %s4359_s23  }
 0xdf8   : > { %p23_p0 = scmp.ge.s32.totalorder %s26_s18, 4  }
 0xdfa   :  { %25 = sbr.rel (!%p23_p0) target bundleno = 8 (0x8), region = 145 }
 0xdff   :  { %2871 = vsyncpa [#allocation4], 1 }
 0xe00   :  { %2873 = vsyncpa [#allocation4 + $0x1], 1 }

</bundles_post_ra>
